<compile_context>
chip_gen: v6e
topology: v6e:2x2x1
jax: 0.10.0
libtpu: 0.0.40
codegen_flags: <defaults>
</compile_context>

<pallas_src>
import functools
import numpy as np

import jax
import jax.numpy as jnp
from jax.experimental import pallas as pl
from jax.experimental.pallas import tpu as pltpu


LANE = 128           # TPU lane width
MIB = 1024 * 1024


# -----------------------------------------------------------------------------
# Python-side dataclass equivalents (no torch)
# -----------------------------------------------------------------------------
class ExpertOutput:
    def __init__(self, expert_id, output_tensor, weight, activation_score,
                 fusion_degree=1.0):
        self.expert_id = expert_id
        self.output_tensor = output_tensor
        self.weight = weight
        self.activation_score = activation_score
        self.fusion_degree = fusion_degree


class MaxExpertsList:
    def __init__(self, experts, max_count=8, threshold=0.1):
        self.experts = experts
        self.max_count = max_count
        self.threshold = threshold

    def add_expert(self, expert_output):
        if expert_output.activation_score >= self.threshold:
            self.experts.append(expert_output)
            self.experts.sort(key=lambda x: x.activation_score, reverse=True)
            if len(self.experts) > self.max_count:
                self.experts = self.experts[: self.max_count]


# -----------------------------------------------------------------------------
# Generation-aware tiling / VMEM budget
# -----------------------------------------------------------------------------
def _round_up(x, m):
    return (x + m - 1) // m * m


def _chip_defaults():
    """Tile sizes / VMEM budget per TPU generation (v5e / v6e / v7x)."""
    kind = ""
    try:
        kind = jax.devices()[0].device_kind.lower()
    except Exception:
        pass
    if "v5 lite" in kind or "v5e" in kind:
        # v5e MXU is 4x128x128: 128-token tiles; 128 MiB physical VMEM.
        return {"tT": 128, "tF": 512, "vmem": 100 * MIB}
    if "v6" in kind:
        # v6e MXU is 2x256x256: 256-token tiles; raise scoped VMEM toward 100 MiB.
        return {"tT": 256, "tF": 512, "vmem": 100 * MIB}
    if "v7" in kind or "tpu7" in kind:
        # v7x has only 64 MiB VMEM per TensorCore: smaller F-chunk + headroom.
        return {"tT": 256, "tF": 256, "vmem": 52 * MIB}
    return {"tT": 256, "tF": 512, "vmem": 64 * MIB}


def _vmem_budget(requested):
    try:
        cap = int(pltpu.get_tpu_info().vmem_capacity_bytes)
        return min(requested, int(cap * 0.85))
    except Exception:
        return requested


# -----------------------------------------------------------------------------
# Fused MoE layer kernel.  Grid = (token tiles i, F-chunks k).
#   k == 0 : logits = h @ Wg (bf16 MXU, f32 acc)  -> hook capture + softmax
#            probs -> VMEM scratch; per-tile prob sums -> psum output;
#            h_out  <- h   (residual init; output block is the accumulator)
#   every k: hid    = relu(h @ W1[:, chunk])       [tT, tF]
#            apply routing weights in f32 (per-expert lane-masked reduce +
#            broadcast multiply — no expand matmul)
#            h_out += weighted_hid @ W2[chunk, :]  (bf16 MXU, f32 acc)
# -----------------------------------------------------------------------------
def moe_layer_kernel(h_ref, wg_ref, w1_ref, w2_ref,
                     h_out_ref, logits_ref, psum_ref,
                     probs_ref, *, num_experts, experts_per_chunk, ffn):
    k = pl.program_id(1)

    h = h_ref[...]                                  # [tT, H] f32 (residual path)
    hb = h.astype(jnp.bfloat16)

    @pl.when(k == 0)
    def _():
        # Gate logits (forward-hook capture equivalent), lane-padded to Epad.
        logits = jnp.dot(hb, wg_ref[...], preferred_element_type=jnp.float32)
        logits_ref[...] = logits
        tT, e_pad = logits.shape
        lane_ids = jax.lax.broadcasted_iota(jnp.int32, (tT, e_pad), 1)
        valid = lane_ids < num_experts
        masked = jnp.where(valid, logits, -1e30)
        m = jnp.max(masked, axis=-1, keepdims=True)
        p = jnp.where(valid, jnp.exp(masked - m), 0.0)
        denom = jnp.sum(p, axis=-1, keepdims=True)
        probs = p * pl.reciprocal(denom, approx=True)        # [tT, Epad] f32
        probs_ref[...] = probs                               # persists over k
        # Fused routing-average statistic (sum over this tile's tokens).
        psum_ref[...] = jnp.sum(probs, axis=0, keepdims=True).reshape(1, 1, e_pad)
        # Residual init: the resident output block doubles as the accumulator.
        h_out_ref[...] = h

    # ---- this chunk of experts: up-projection + ReLU (bf16 MXU, f32 acc) ----
    hid = jnp.maximum(
        jnp.dot(hb, w1_ref[...], preferred_element_type=jnp.float32), 0.0)  # [tT, tF]

    # Apply routing weights in f32 (VPU/XLU): per-expert column extract via a
    # lane-masked reduce, then a lane-broadcast multiply.  Static unroll over
    # the (small) experts-per-chunk count; all slices are static & 128-aligned.
    probs = probs_ref[...]                                   # [tT, Epad] f32
    tT, e_pad = probs.shape
    lane_ids = jax.lax.broadcasted_iota(jnp.int32, (tT, e_pad), 1)
    e0 = k * experts_per_chunk
    pieces = []
    for el in range(experts_per_chunk):
        w_col = jnp.sum(jnp.where(lane_ids == e0 + el, probs, 0.0),
                        axis=-1, keepdims=True)              # [tT, 1] f32
        pieces.append(hid[:, el * ffn:(el + 1) * ffn] * w_col)
    weighted = pieces[0] if len(pieces) == 1 else jnp.concatenate(pieces, axis=-1)

    # Down-projection chunk, accumulated into the residual/output block.
    h_out_ref[...] += jnp.dot(weighted.astype(jnp.bfloat16), w2_ref[...],
                              preferred_element_type=jnp.float32)


def prepare_layer_weights(wg, w1, w2):
    """Flatten + lane-pad + bf16-cast weights once, host-side (at init)."""
    H, E = wg.shape
    F = w1.shape[2]
    e_pad = _round_up(max(E, LANE), LANE)
    wg_pad = jnp.zeros((H, e_pad), jnp.float32).at[:, :E].set(wg)
    wg_pad = wg_pad.astype(jnp.bfloat16)
    w1_flat = jnp.transpose(w1, (1, 0, 2)).reshape(H, E * F).astype(jnp.bfloat16)
    w2_flat = w2.reshape(E * F, H).astype(jnp.bfloat16)
    return wg_pad, w1_flat, w2_flat


def moe_layer(h, wg_pad, w1_flat, w2_flat, num_experts, ffn, *,
              token_tile=None, f_chunk=None):
    T, H = h.shape
    e_pad = wg_pad.shape[1]
    EF = w1_flat.shape[1]
    E = num_experts
    assert ffn % LANE == 0, "ffn must be lane-aligned"  # TODO(synk): pad F otherwise

    cfg = _chip_defaults()
    tT = token_tile or min(cfg["tT"], T)
    assert T % tT == 0, "token count must be a multiple of the token tile"
    n_tiles = T // tT

    # Experts per F-chunk: chunk boundaries stay aligned to expert boundaries.
    eg = max(1, min(E, (f_chunk or cfg["tF"]) // ffn))
    while E % eg != 0:
        eg -= 1
    tF = eg * ffn
    n_f = EF // tF

    kernel = functools.partial(moe_layer_kernel, num_experts=E,
                               experts_per_chunk=eg, ffn=ffn)
    return pl.pallas_call(
        kernel,
        out_shape=(
            jax.ShapeDtypeStruct((T, H), jnp.float32),              # h_out
            jax.ShapeDtypeStruct((T, e_pad), jnp.float32),           # gate logits (padded)
            jax.ShapeDtypeStruct((n_tiles, 1, e_pad), jnp.float32),  # prob sums
        ),
        grid_spec=pltpu.PrefetchScalarGridSpec(
            num_scalar_prefetch=0,
            grid=(n_tiles, n_f),                 # token tiles outer, F-chunks inner
            in_specs=[
                pl.BlockSpec((tT, H), lambda i, k: (i, 0)),
                # TODO(synk): pipeline_mode=pl.Buffered(1) on this grid-invariant
                # gate weight to halve its (already tiny) VMEM footprint.
                pl.BlockSpec((H, e_pad), lambda i, k: (0, 0)),
                # Streamed expert weights: F-tiled along the reduction axis so
                # VMEM holds only ~2x2xHxtF bf16 regardless of E*F.
                # TODO(synk): pl.Buffered(3) on v5e/v6e if DMA is exposed.
                pl.BlockSpec((H, tF), lambda i, k: (0, k)),
                pl.BlockSpec((tF, H), lambda i, k: (k, 0)),
            ],
            out_specs=(
                pl.BlockSpec((tT, H), lambda i, k: (i, 0)),
                pl.BlockSpec((tT, e_pad), lambda i, k: (i, 0)),
                pl.BlockSpec((1, 1, e_pad), lambda i, k: (i, 0, 0)),
            ),
            scratch_shapes=[pltpu.VMEM((tT, e_pad), jnp.float32)],   # probs
        ),
        input_output_aliases={0: 0},             # h -> h_out (in-place residual)
        compiler_params=pltpu.CompilerParams(
            dimension_semantics=("parallel", "arbitrary"),
            vmem_limit_bytes=_vmem_budget(cfg["vmem"])),
    )(h, wg_pad, w1_flat, w2_flat)


# -----------------------------------------------------------------------------
# Pure-JAX reference of one synthesized MoE layer (dense soft routing).
# -----------------------------------------------------------------------------
def moe_layer_ref(h, wg, w1, w2):
    logits = h @ wg                                        # [T, E]
    probs = jax.nn.softmax(logits, axis=-1)
    hid = jnp.maximum(jnp.einsum("th,ehf->tef", h, w1), 0.0)
    eo = jnp.einsum("te,tef,efh->th", probs, hid, w2)
    return h + eo, logits


# -----------------------------------------------------------------------------
# Whole first pass (embedding lookup + all MoE layers), jitted once.
# -----------------------------------------------------------------------------
def _forward_core(embedding, tokens, layers, *, num_experts, ffn):
    h = jnp.take(embedding, tokens, axis=0)                 # [T, H] (gather glue)
    e_pad = layers[0][0].shape[1]
    prob_sum = jnp.zeros((e_pad,), jnp.float32)
    logits_all = []
    for (wg_pad, w1_flat, w2_flat) in layers:
        h, logits_pad, psum = moe_layer(h, wg_pad, w1_flat, w2_flat,
                                        num_experts, ffn)
        logits_all.append(logits_pad)
        prob_sum = prob_sum + jnp.sum(psum, axis=(0, 1))    # [Epad]
    return h, jnp.stack(logits_all), prob_sum


# -----------------------------------------------------------------------------
# DualOutputMoE (JAX/Pallas version): first-pass forward
# -----------------------------------------------------------------------------
class DualOutputMoEPallas:
    def __init__(self, num_layers, vocab, hidden, ffn, num_experts, key):
        self.num_experts = num_experts
        self.num_layers = num_layers
        self.ffn = ffn
        keys = jax.random.split(key, 1 + 3 * num_layers)
        self.embedding = jax.random.normal(keys[0], (vocab, hidden), jnp.float32)
        sg = 1.0 / float(np.sqrt(hidden))
        s1 = 1.0 / float(np.sqrt(hidden))
        s2 = 1.0 / float(np.sqrt(ffn))
        self.raw_layers = []
        self.prepared_layers = []
        for li in range(num_layers):
            k1, k2, k3 = keys[1 + 3 * li: 4 + 3 * li]
            wg = jax.random.normal(k1, (hidden, num_experts), jnp.float32) * sg
            w1 = jax.random.normal(k2, (num_experts, hidden, ffn), jnp.float32) * s1
            w2 = jax.random.normal(k3, (num_experts, ffn, hidden), jnp.float32) * s2
            self.raw_layers.append((wg, w1, w2))
            self.prepared_layers.append(prepare_layer_weights(wg, w1, w2))
        # One jit for the whole layer loop: removes per-layer dispatch overhead
        # and lets XLA overlap layer N's weight DMA with layer N-1's epilogue.
        self._jit_forward = jax.jit(functools.partial(
            _forward_core, num_experts=num_experts, ffn=ffn))
        self.max_experts_cache = None
        self.captured_routing_logits = []
        self.last_avg_probs = None

    def forward_first_pass(self, tokens, seqlens=None):
        # TODO(synk): seqlens is accepted but padding tokens are not masked out
        # of the routing average (matches the original's token-mean behavior).
        E = self.num_experts
        h, logits_stack, prob_sum = self._jit_forward(
            self.embedding, tokens, tuple(self.prepared_layers))
        T = int(h.shape[0])

        # Hook-capture equivalent: per-layer gate logits (real experts only).
        self.captured_routing_logits = [logits_stack[li, :, :E]
                                        for li in range(self.num_layers)]
        avg_probs = prob_sum[:E] / float(T * self.num_layers)

        # Single host sync after all layers (off the hot path).
        avg_np = np.asarray(jax.device_get(avg_probs))
        self.last_avg_probs = avg_np
        all_experts = []
        for expert_id in range(E):
            score = float(avg_np[expert_id])
            all_experts.append(ExpertOutput(expert_id=expert_id,
                                            output_tensor=None,
                                            weight=score,
                                            activation_score=score))
        all_experts.sort(key=lambda x: x.activation_score, reverse=True)
        max_experts = MaxExpertsList(experts=[], max_count=E)
        for ex in all_experts:
            max_experts.add_expert(ex)
        self.max_experts_cache = max_experts
        return h, max_experts

    def __call__(self, input_tensor, assistant_vector=None,
                 return_max_experts=False):
        if assistant_vector is None:
            first_output, max_experts = self.forward_first_pass(input_tensor)
            if return_max_experts:
                return first_output, max_experts
            return first_output
        # TODO(synk): forward_second_pass requires the wrapped model's attention
        # layers + final norm (causal-mask path); the wrapped model is not
        # defined in this spec.
        raise NotImplementedError("second pass requires the wrapped model")


# -----------------------------------------------------------------------------
if __name__ == "__main__":
    # Small shapes consistent with the module's forward: tokens [T], hidden H,
    # ffn F, E experts, L layers.  H/F chosen as 128 so all tiles are lane-dense.
    T, H, F, E, L, V = 8, 128, 128, 8, 2, 64

    key = jax.random.PRNGKey(0)
    k_tok, k_model = jax.random.split(key)
    tokens = jax.random.randint(k_tok, (T,), 0, V, dtype=jnp.int32)

    model = DualOutputMoEPallas(num_layers=L, vocab=V, hidden=H, ffn=F,
                                num_experts=E, key=k_model)

    out, max_experts = model(tokens, return_max_experts=True)
    out = jax.block_until_ready(out)

    # ---- pure-JAX (f32) reference of the whole first pass ----
    h_ref = jnp.take(model.embedding, tokens, axis=0)
    ref_avg = jnp.zeros((E,), jnp.float32)
    for (wg, w1, w2) in model.raw_layers:
        h_ref, logits = moe_layer_ref(h_ref, wg, w1, w2)
        ref_avg = ref_avg + jax.nn.softmax(logits, axis=-1).mean(axis=0)
    ref_avg = ref_avg / L

    # ---- single-layer check (bf16 MXU vs f32 reference -> loose tolerance) ----
    h0 = jnp.take(model.embedding, tokens, axis=0)
    wg0, w10, w20 = model.raw_layers[0]
    ref_h1, ref_logits0 = moe_layer_ref(h0, wg0, w10, w20)     # refs before kernel
    got_h1, got_logits_pad, got_psum = moe_layer(
        h0, *model.prepared_layers[0], E, F)
    np.testing.assert_allclose(np.asarray(got_logits_pad[:, :E]),
                               np.asarray(ref_logits0), rtol=3e-2, atol=3e-2)
    np.testing.assert_allclose(np.asarray(got_h1), np.asarray(ref_h1),
                               rtol=3e-2, atol=3e-2)

    # ---- full forward checks ----
    assert out.shape == (T, H)
    np.testing.assert_allclose(np.asarray(out), np.asarray(h_ref),
                               rtol=5e-2, atol=5e-2)
    np.testing.assert_allclose(model.last_avg_probs, np.asarray(ref_avg),
                               rtol=2e-2, atol=2e-2)
    assert len(model.captured_routing_logits) == L
    assert len(max_experts.experts) <= E
    # average routing probabilities sum (over real experts) ~ 1
    assert abs(float(model.last_avg_probs.sum()) - 1.0) < 1e-2

    print("KERNEL_OK")
</pallas_src>

<mosaic_0001>
module attributes {stable_mosaic.version = 11 : i64} {
  func.func @moe_layer_kernel(%arg0: i32, %arg1: i32, %arg2: memref<8x128xf32, #tpu.memory_space<vmem>>, %arg3: memref<128x128xbf16, #tpu.memory_space<vmem>>, %arg4: memref<128x512xbf16, #tpu.memory_space<vmem>>, %arg5: memref<512x128xbf16, #tpu.memory_space<vmem>>, %arg6: memref<8x128xf32, #tpu.memory_space<vmem>>, %arg7: memref<8x128xf32, #tpu.memory_space<vmem>>, %arg8: memref<1x1x128xf32, #tpu.memory_space<vmem>>, %arg9: memref<8x128xf32, #tpu.memory_space<vmem>>) attributes {dimension_semantics = [#tpu.dimension_semantics<parallel>, #tpu.dimension_semantics<arbitrary>], iteration_bounds = array<i64: 1, 2>, scalar_prefetch = 0 : i64, scratch_operands = 1 : i64, tpu.core_type = #tpu.core_type<tc>, window_params = [{transform_indices = @transform_0, window_bounds = array<i64: 8, 128>}, {pipeline_mode = #tpu.pipeline_mode<synchronous>, transform_indices = @transform_1, window_bounds = array<i64: 128, 128>}, {transform_indices = @transform_2, window_bounds = array<i64: 128, 512>}, {transform_indices = @transform_3, window_bounds = array<i64: 512, 128>}, {transform_indices = @transform_4, window_bounds = array<i64: 8, 128>}, {transform_indices = @transform_5, window_bounds = array<i64: 8, 128>}, {transform_indices = @transform_6, window_bounds = array<i64: 1, 1, 128>}]} {
    %c0 = arith.constant 0 : index
    %c0_0 = arith.constant 0 : index
    %0 = vector.load %arg2[%c0, %c0_0] : memref<8x128xf32, #tpu.memory_space<vmem>>, vector<8x128xf32>
    %1 = arith.truncf %0 : vector<8x128xf32> to vector<8x128xbf16>
    %c0_i32 = arith.constant 0 : i32
    %2 = arith.cmpi eq, %arg1, %c0_i32 : i32
    %3 = arith.extui %2 : i1 to i32
    %c0_i32_1 = arith.constant 0 : i32
    %4 = arith.cmpi ne, %3, %c0_i32_1 : i32
    scf.if %4 {
      %c0_23 = arith.constant 0 : index
      %c0_24 = arith.constant 0 : index
      %59 = vector.load %arg3[%c0_23, %c0_24] : memref<128x128xbf16, #tpu.memory_space<vmem>>, vector<128x128xbf16>
      %cst_25 = arith.constant dense<0.000000e+00> : vector<8x128xf32>
      %60 = tpu.matmul %1, %59, %cst_25 {dimension_numbers = #tpu.dot_dimension_numbers<[1], [0], [0], [1], [0, 0, 1, 1], [], []>} : vector<8x128xbf16>, vector<128x128xbf16>, vector<8x128xf32> -> vector<8x128xf32>
      %c0_26 = arith.constant 0 : index
      %c0_27 = arith.constant 0 : index
      %61 = vector.load %arg7[%c0_26, %c0_27] : memref<8x128xf32, #tpu.memory_space<vmem>>, vector<8x128xf32>
      tpu.vector_store %arg7[%c0_26, %c0_27], %60 {strides = array<i32>} : memref<8x128xf32, #tpu.memory_space<vmem>>, vector<8x128xf32>,
      %62 = tpu.iota {dimensions = array<i32: 1>} : vector<8x128xi32>
      %c8_i32 = arith.constant 8 : i32
      %63 = vector.broadcast %c8_i32 : i32 to vector<8x128xi32>
      %64 = arith.cmpi slt, %62, %63 : vector<8x128xi32>
      %cst_28 = arith.constant -1.000000e+30 : f32
      %65 = vector.broadcast %cst_28 : f32 to vector<8x128xf32>
      %66 = arith.select %64, %60, %65 : vector<8x128xi1>, vector<8x128xf32>
      %cst_29 = arith.constant dense<0xFF800000> : vector<8xf32>
      %67 = vector.multi_reduction <maximumf>, %66, %cst_29 [1] : vector<8x128xf32> to vector<8xf32>
      %68 = vector.shape_cast %67 : vector<8xf32> to vector<8x1xf32>
      %69 = vector.broadcast %68 : vector<8x1xf32> to vector<8x128xf32>
      %70 = arith.subf %66, %69 : vector<8x128xf32>
      %71 = math.exp %70 : vector<8x128xf32>
      %cst_30 = arith.constant 0.000000e+00 : f32
      %72 = vector.broadcast %cst_30 : f32 to vector<8x128xf32>
      %73 = arith.select %64, %71, %72 : vector<8x128xi1>, vector<8x128xf32>
      %cst_31 = arith.constant dense<0.000000e+00> : vector<8xf32>
      %74 = vector.multi_reduction <add>, %73, %cst_31 [1] : vector<8x128xf32> to vector<8xf32>
      %75 = vector.shape_cast %74 : vector<8xf32> to vector<8x1xf32>
      %76 = tpu.reciprocal %75 {approx = true} : vector<8x1xf32> -> vector<8x1xf32>
      %77 = vector.broadcast %76 : vector<8x1xf32> to vector<8x128xf32>
      %78 = arith.mulf %73, %77 : vector<8x128xf32>
      %c0_32 = arith.constant 0 : index
      %c0_33 = arith.constant 0 : index
      %79 = vector.load %arg9[%c0_32, %c0_33] : memref<8x128xf32, #tpu.memory_space<vmem>>, vector<8x128xf32>
      tpu.vector_store %arg9[%c0_32, %c0_33], %78 {strides = array<i32>} : memref<8x128xf32, #tpu.memory_space<vmem>>, vector<8x128xf32>,
      %cst_34 = arith.constant dense<0.000000e+00> : vector<128xf32>
      %80 = vector.multi_reduction <add>, %78, %cst_34 [0] : vector<8x128xf32> to vector<128xf32>
      %81 = vector.shape_cast %80 : vector<128xf32> to vector<1x128xf32>
      %82 = vector.shape_cast %81 : vector<1x128xf32> to vector<1x1x128xf32>
      %c0_35 = arith.constant 0 : index
      %c0_36 = arith.constant 0 : index
      %c0_37 = arith.constant 0 : index
      %83 = vector.load %arg8[%c0_35, %c0_36, %c0_37] : memref<1x1x128xf32, #tpu.memory_space<vmem>>, vector<1x1x128xf32>
      tpu.vector_store %arg8[%c0_35, %c0_36, %c0_37], %82 {strides = array<i32>} : memref<1x1x128xf32, #tpu.memory_space<vmem>>, vector<1x1x128xf32>,
      %c0_38 = arith.constant 0 : index
      %c0_39 = arith.constant 0 : index
      %84 = vector.load %arg6[%c0_38, %c0_39] : memref<8x128xf32, #tpu.memory_space<vmem>>, vector<8x128xf32>
      tpu.vector_store %arg6[%c0_38, %c0_39], %0 {strides = array<i32>} : memref<8x128xf32, #tpu.memory_space<vmem>>, vector<8x128xf32>,
    } else {
    }
    %c0_2 = arith.constant 0 : index
    %c0_3 = arith.constant 0 : index
    %5 = vector.load %arg4[%c0_2, %c0_3] : memref<128x512xbf16, #tpu.memory_space<vmem>>, vector<128x512xbf16>
    %cst = arith.constant dense<0.000000e+00> : vector<8x512xf32>
    %6 = tpu.matmul %1, %5, %cst {dimension_numbers = #tpu.dot_dimension_numbers<[1], [0], [0], [1], [0, 0, 1, 1], [], []>} : vector<8x128xbf16>, vector<128x512xbf16>, vector<8x512xf32> -> vector<8x512xf32>
    %cst_4 = arith.constant 0.000000e+00 : f32
    %7 = vector.broadcast %cst_4 : f32 to vector<8x512xf32>
    %8 = arith.maximumf %6, %7 : vector<8x512xf32>
    %c0_5 = arith.constant 0 : index
    %c0_6 = arith.constant 0 : index
    %9 = vector.load %arg9[%c0_5, %c0_6] : memref<8x128xf32, #tpu.memory_space<vmem>>, vector<8x128xf32>
    %10 = tpu.iota {dimensions = array<i32: 1>} : vector<8x128xi32>
    %c4_i32 = arith.constant 4 : i32
    %11 = arith.muli %arg1, %c4_i32 : i32
    %c0_i32_7 = arith.constant 0 : i32
    %12 = arith.addi %11, %c0_i32_7 : i32
    %13 = vector.broadcast %12 : i32 to vector<8x128xi32>
    %14 = arith.cmpi eq, %10, %13 : vector<8x128xi32>
    %cst_8 = arith.constant 0.000000e+00 : f32
    %15 = vector.broadcast %cst_8 : f32 to vector<8x128xf32>
    %16 = arith.select %14, %9, %15 : vector<8x128xi1>, vector<8x128xf32>
    %cst_9 = arith.constant dense<0.000000e+00> : vector<8xf32>
    %17 = vector.multi_reduction <add>, %16, %cst_9 [1] : vector<8x128xf32> to vector<8xf32>
    %18 = vector.shape_cast %17 : vector<8xf32> to vector<8x1xf32>
    %19 = vector.extract_strided_slice %8 {offsets = [0, 0], sizes = [8, 128], strides = [1, 1]} : vector<8x512xf32> to vector<8x128xf32>
    %20 = vector.broadcast %18 : vector<8x1xf32> to vector<8x128xf32>
    %21 = arith.mulf %19, %20 : vector<8x128xf32>
    %c1_i32 = arith.constant 1 : i32
    %22 = arith.addi %11, %c1_i32 : i32
    %23 = vector.broadcast %22 : i32 to vector<8x128xi32>
    %24 = arith.cmpi eq, %10, %23 : vector<8x128xi32>
    %cst_10 = arith.constant 0.000000e+00 : f32
    %25 = vector.broadcast %cst_10 : f32 to vector<8x128xf32>
    %26 = arith.select %24, %9, %25 : vector<8x128xi1>, vector<8x128xf32>
    %cst_11 = arith.constant dense<0.000000e+00> : vector<8xf32>
    %27 = vector.multi_reduction <add>, %26, %cst_11 [1] : vector<8x128xf32> to vector<8xf32>
    %28 = vector.shape_cast %27 : vector<8xf32> to vector<8x1xf32>
    %29 = vector.extract_strided_slice %8 {offsets = [0, 128], sizes = [8, 128], strides = [1, 1]} : vector<8x512xf32> to vector<8x128xf32>
    %30 = vector.broadcast %28 : vector<8x1xf32> to vector<8x128xf32>
    %31 = arith.mulf %29, %30 : vector<8x128xf32>
    %c2_i32 = arith.constant 2 : i32
    %32 = arith.addi %11, %c2_i32 : i32
    %33 = vector.broadcast %32 : i32 to vector<8x128xi32>
    %34 = arith.cmpi eq, %10, %33 : vector<8x128xi32>
    %cst_12 = arith.constant 0.000000e+00 : f32
    %35 = vector.broadcast %cst_12 : f32 to vector<8x128xf32>
    %36 = arith.select %34, %9, %35 : vector<8x128xi1>, vector<8x128xf32>
    %cst_13 = arith.constant dense<0.000000e+00> : vector<8xf32>
    %37 = vector.multi_reduction <add>, %36, %cst_13 [1] : vector<8x128xf32> to vector<8xf32>
    %38 = vector.shape_cast %37 : vector<8xf32> to vector<8x1xf32>
    %39 = vector.extract_strided_slice %8 {offsets = [0, 256], sizes = [8, 128], strides = [1, 1]} : vector<8x512xf32> to vector<8x128xf32>
    %40 = vector.broadcast %38 : vector<8x1xf32> to vector<8x128xf32>
    %41 = arith.mulf %39, %40 : vector<8x128xf32>
    %c3_i32 = arith.constant 3 : i32
    %42 = arith.addi %11, %c3_i32 : i32
    %43 = vector.broadcast %42 : i32 to vector<8x128xi32>
    %44 = arith.cmpi eq, %10, %43 : vector<8x128xi32>
    %cst_14 = arith.constant 0.000000e+00 : f32
    %45 = vector.broadcast %cst_14 : f32 to vector<8x128xf32>
    %46 = arith.select %44, %9, %45 : vector<8x128xi1>, vector<8x128xf32>
    %cst_15 = arith.constant dense<0.000000e+00> : vector<8xf32>
    %47 = vector.multi_reduction <add>, %46, %cst_15 [1] : vector<8x128xf32> to vector<8xf32>
    %48 = vector.shape_cast %47 : vector<8xf32> to vector<8x1xf32>
    %49 = vector.extract_strided_slice %8 {offsets = [0, 384], sizes = [8, 128], strides = [1, 1]} : vector<8x512xf32> to vector<8x128xf32>
    %50 = vector.broadcast %48 : vector<8x1xf32> to vector<8x128xf32>
    %51 = arith.mulf %49, %50 : vector<8x128xf32>
    %52 = tpu.concatenate %21, %31, %41, %51 in 1 : vector<8x128xf32>, vector<8x128xf32>, vector<8x128xf32>, vector<8x128xf32> -> vector<8x512xf32>
    %c0_16 = arith.constant 0 : index
    %c0_17 = arith.constant 0 : index
    %53 = vector.load %arg6[%c0_16, %c0_17] : memref<8x128xf32, #tpu.memory_space<vmem>>, vector<8x128xf32>
    %54 = arith.truncf %52 : vector<8x512xf32> to vector<8x512xbf16>
    %c0_18 = arith.constant 0 : index
    %c0_19 = arith.constant 0 : index
    %55 = vector.load %arg5[%c0_18, %c0_19] : memref<512x128xbf16, #tpu.memory_space<vmem>>, vector<512x128xbf16>
    %cst_20 = arith.constant dense<0.000000e+00> : vector<8x128xf32>
    %56 = tpu.matmul %54, %55, %cst_20 {dimension_numbers = #tpu.dot_dimension_numbers<[1], [0], [0], [1], [0, 0, 1, 1], [], []>} : vector<8x512xbf16>, vector<512x128xbf16>, vector<8x128xf32> -> vector<8x128xf32>
    %57 = arith.addf %53, %56 : vector<8x128xf32>
    %c0_21 = arith.constant 0 : index
    %c0_22 = arith.constant 0 : index
    %58 = vector.load %arg6[%c0_21, %c0_22] : memref<8x128xf32, #tpu.memory_space<vmem>>, vector<8x128xf32>
    tpu.vector_store %arg6[%c0_21, %c0_22], %57 {strides = array<i32>} : memref<8x128xf32, #tpu.memory_space<vmem>>, vector<8x128xf32>,
    return
  }
  func.func @transform_0(%arg0: i32, %arg1: i32) -> (i32, i32) {
    %c0_i32 = arith.constant 0 : i32
    %c0_i32_0 = arith.constant 0 : i32
    return %arg0, %c0_i32 : i32, i32
  }
  func.func @transform_1(%arg0: i32, %arg1: i32) -> (i32, i32) {
    %c0_i32 = arith.constant 0 : i32
    %c0_i32_0 = arith.constant 0 : i32
    %c0_i32_1 = arith.constant 0 : i32
    return %c0_i32, %c0_i32_0 : i32, i32
  }
  func.func @transform_2(%arg0: i32, %arg1: i32) -> (i32, i32) {
    %c0_i32 = arith.constant 0 : i32
    %c0_i32_0 = arith.constant 0 : i32
    return %c0_i32, %arg1 : i32, i32
  }
  func.func @transform_3(%arg0: i32, %arg1: i32) -> (i32, i32) {
    %c0_i32 = arith.constant 0 : i32
    %c0_i32_0 = arith.constant 0 : i32
    return %arg1, %c0_i32 : i32, i32
  }
  func.func @transform_4(%arg0: i32, %arg1: i32) -> (i32, i32) {
    %c0_i32 = arith.constant 0 : i32
    %c0_i32_0 = arith.constant 0 : i32
    return %arg0, %c0_i32 : i32, i32
  }
  func.func @transform_5(%arg0: i32, %arg1: i32) -> (i32, i32) {
    %c0_i32 = arith.constant 0 : i32
    %c0_i32_0 = arith.constant 0 : i32
    return %arg0, %c0_i32 : i32, i32
  }
  func.func @transform_6(%arg0: i32, %arg1: i32) -> (i32, i32, i32) {
    %c0_i32 = arith.constant 0 : i32
    %c0_i32_0 = arith.constant 0 : i32
    %c0_i32_1 = arith.constant 0 : i32
    return %arg0, %c0_i32, %c0_i32_0 : i32, i32, i32
  }
}

module attributes {stable_mosaic.version = 11 : i64} {
  func.func @moe_layer_kernel(%arg0: i32, %arg1: i32, %arg2: memref<8x128xf32, #tpu.memory_space<vmem>>, %arg3: memref<128x128xbf16, #tpu.memory_space<vmem>>, %arg4: memref<128x512xbf16, #tpu.memory_space<vmem>>, %arg5: memref<512x128xbf16, #tpu.memory_space<vmem>>, %arg6: memref<8x128xf32, #tpu.memory_space<vmem>>, %arg7: memref<8x128xf32, #tpu.memory_space<vmem>>, %arg8: memref<1x1x128xf32, #tpu.memory_space<vmem>>, %arg9: memref<8x128xf32, #tpu.memory_space<vmem>>) attributes {dimension_semantics = [#tpu.dimension_semantics<parallel>, #tpu.dimension_semantics<arbitrary>], iteration_bounds = array<i64: 1, 2>, scalar_prefetch = 0 : i64, scratch_operands = 1 : i64, tpu.core_type = #tpu.core_type<tc>, window_params = [{transform_indices = @transform_0, window_bounds = array<i64: 8, 128>}, {pipeline_mode = #tpu.pipeline_mode<synchronous>, transform_indices = @transform_1, window_bounds = array<i64: 128, 128>}, {transform_indices = @transform_2, window_bounds = array<i64: 128, 512>}, {transform_indices = @transform_3, window_bounds = array<i64: 512, 128>}, {transform_indices = @transform_4, window_bounds = array<i64: 8, 128>}, {transform_indices = @transform_5, window_bounds = array<i64: 8, 128>}, {transform_indices = @transform_6, window_bounds = array<i64: 1, 1, 128>}]} {
    %c0 = arith.constant 0 : index
    %c0_0 = arith.constant 0 : index
    %0 = vector.load %arg2[%c0, %c0_0] : memref<8x128xf32, #tpu.memory_space<vmem>>, vector<8x128xf32>
    %1 = arith.truncf %0 : vector<8x128xf32> to vector<8x128xbf16>
    %c0_i32 = arith.constant 0 : i32
    %2 = arith.cmpi eq, %arg1, %c0_i32 : i32
    %3 = arith.extui %2 : i1 to i32
    %c0_i32_1 = arith.constant 0 : i32
    %4 = arith.cmpi ne, %3, %c0_i32_1 : i32
    scf.if %4 {
      %c0_23 = arith.constant 0 : index
      %c0_24 = arith.constant 0 : index
      %59 = vector.load %arg3[%c0_23, %c0_24] : memref<128x128xbf16, #tpu.memory_space<vmem>>, vector<128x128xbf16>
      %cst_25 = arith.constant dense<0.000000e+00> : vector<8x128xf32>
      %60 = tpu.matmul %1, %59, %cst_25 {dimension_numbers = #tpu.dot_dimension_numbers<[1], [0], [0], [1], [0, 0, 1, 1], [], []>} : vector<8x128xbf16>, vector<128x128xbf16>, vector<8x128xf32> -> vector<8x128xf32>
      %c0_26 = arith.constant 0 : index
      %c0_27 = arith.constant 0 : index
      %61 = vector.load %arg7[%c0_26, %c0_27] : memref<8x128xf32, #tpu.memory_space<vmem>>, vector<8x128xf32>
      tpu.vector_store %arg7[%c0_26, %c0_27], %60 {strides = array<i32>} : memref<8x128xf32, #tpu.memory_space<vmem>>, vector<8x128xf32>,
      %62 = tpu.iota {dimensions = array<i32: 1>} : vector<8x128xi32>
      %c8_i32 = arith.constant 8 : i32
      %63 = vector.broadcast %c8_i32 : i32 to vector<8x128xi32>
      %64 = arith.cmpi slt, %62, %63 : vector<8x128xi32>
      %cst_28 = arith.constant -1.000000e+30 : f32
      %65 = vector.broadcast %cst_28 : f32 to vector<8x128xf32>
      %66 = arith.select %64, %60, %65 : vector<8x128xi1>, vector<8x128xf32>
      %cst_29 = arith.constant dense<0xFF800000> : vector<8xf32>
      %67 = vector.multi_reduction <maximumf>, %66, %cst_29 [1] : vector<8x128xf32> to vector<8xf32>
      %68 = vector.shape_cast %67 : vector<8xf32> to vector<8x1xf32>
      %69 = vector.broadcast %68 : vector<8x1xf32> to vector<8x128xf32>
      %70 = arith.subf %66, %69 : vector<8x128xf32>
      %71 = math.exp %70 : vector<8x128xf32>
      %cst_30 = arith.constant 0.000000e+00 : f32
      %72 = vector.broadcast %cst_30 : f32 to vector<8x128xf32>
      %73 = arith.select %64, %71, %72 : vector<8x128xi1>, vector<8x128xf32>
      %cst_31 = arith.constant dense<0.000000e+00> : vector<8xf32>
      %74 = vector.multi_reduction <add>, %73, %cst_31 [1] : vector<8x128xf32> to vector<8xf32>
      %75 = vector.shape_cast %74 : vector<8xf32> to vector<8x1xf32>
      %76 = tpu.reciprocal %75 {approx = true} : vector<8x1xf32> -> vector<8x1xf32>
      %77 = vector.broadcast %76 : vector<8x1xf32> to vector<8x128xf32>
      %78 = arith.mulf %73, %77 : vector<8x128xf32>
      %c0_32 = arith.constant 0 : index
      %c0_33 = arith.constant 0 : index
      %79 = vector.load %arg9[%c0_32, %c0_33] : memref<8x128xf32, #tpu.memory_space<vmem>>, vector<8x128xf32>
      tpu.vector_store %arg9[%c0_32, %c0_33], %78 {strides = array<i32>} : memref<8x128xf32, #tpu.memory_space<vmem>>, vector<8x128xf32>,
      %cst_34 = arith.constant dense<0.000000e+00> : vector<128xf32>
      %80 = vector.multi_reduction <add>, %78, %cst_34 [0] : vector<8x128xf32> to vector<128xf32>
      %81 = vector.shape_cast %80 : vector<128xf32> to vector<1x128xf32>
      %82 = vector.shape_cast %81 : vector<1x128xf32> to vector<1x1x128xf32>
      %c0_35 = arith.constant 0 : index
      %c0_36 = arith.constant 0 : index
      %c0_37 = arith.constant 0 : index
      %83 = vector.load %arg8[%c0_35, %c0_36, %c0_37] : memref<1x1x128xf32, #tpu.memory_space<vmem>>, vector<1x1x128xf32>
      tpu.vector_store %arg8[%c0_35, %c0_36, %c0_37], %82 {strides = array<i32>} : memref<1x1x128xf32, #tpu.memory_space<vmem>>, vector<1x1x128xf32>,
      %c0_38 = arith.constant 0 : index
      %c0_39 = arith.constant 0 : index
      %84 = vector.load %arg6[%c0_38, %c0_39] : memref<8x128xf32, #tpu.memory_space<vmem>>, vector<8x128xf32>
      tpu.vector_store %arg6[%c0_38, %c0_39], %0 {strides = array<i32>} : memref<8x128xf32, #tpu.memory_space<vmem>>, vector<8x128xf32>,
    } else {
    }
    %c0_2 = arith.constant 0 : index
    %c0_3 = arith.constant 0 : index
    %5 = vector.load %arg4[%c0_2, %c0_3] : memref<128x512xbf16, #tpu.memory_space<vmem>>, vector<128x512xbf16>
    %cst = arith.constant dense<0.000000e+00> : vector<8x512xf32>
    %6 = tpu.matmul %1, %5, %cst {dimension_numbers = #tpu.dot_dimension_numbers<[1], [0], [0], [1], [0, 0, 1, 1], [], []>} : vector<8x128xbf16>, vector<128x512xbf16>, vector<8x512xf32> -> vector<8x512xf32>
    %cst_4 = arith.constant 0.000000e+00 : f32
    %7 = vector.broadcast %cst_4 : f32 to vector<8x512xf32>
    %8 = arith.maximumf %6, %7 : vector<8x512xf32>
    %c0_5 = arith.constant 0 : index
    %c0_6 = arith.constant 0 : index
    %9 = vector.load %arg9[%c0_5, %c0_6] : memref<8x128xf32, #tpu.memory_space<vmem>>, vector<8x128xf32>
    %10 = tpu.iota {dimensions = array<i32: 1>} : vector<8x128xi32>
    %c4_i32 = arith.constant 4 : i32
    %11 = arith.muli %arg1, %c4_i32 : i32
    %c0_i32_7 = arith.constant 0 : i32
    %12 = arith.addi %11, %c0_i32_7 : i32
    %13 = vector.broadcast %12 : i32 to vector<8x128xi32>
    %14 = arith.cmpi eq, %10, %13 : vector<8x128xi32>
    %cst_8 = arith.constant 0.000000e+00 : f32
    %15 = vector.broadcast %cst_8 : f32 to vector<8x128xf32>
    %16 = arith.select %14, %9, %15 : vector<8x128xi1>, vector<8x128xf32>
    %cst_9 = arith.constant dense<0.000000e+00> : vector<8xf32>
    %17 = vector.multi_reduction <add>, %16, %cst_9 [1] : vector<8x128xf32> to vector<8xf32>
    %18 = vector.shape_cast %17 : vector<8xf32> to vector<8x1xf32>
    %19 = vector.extract_strided_slice %8 {offsets = [0, 0], sizes = [8, 128], strides = [1, 1]} : vector<8x512xf32> to vector<8x128xf32>
    %20 = vector.broadcast %18 : vector<8x1xf32> to vector<8x128xf32>
    %21 = arith.mulf %19, %20 : vector<8x128xf32>
    %c1_i32 = arith.constant 1 : i32
    %22 = arith.addi %11, %c1_i32 : i32
    %23 = vector.broadcast %22 : i32 to vector<8x128xi32>
    %24 = arith.cmpi eq, %10, %23 : vector<8x128xi32>
    %cst_10 = arith.constant 0.000000e+00 : f32
    %25 = vector.broadcast %cst_10 : f32 to vector<8x128xf32>
    %26 = arith.select %24, %9, %25 : vector<8x128xi1>, vector<8x128xf32>
    %cst_11 = arith.constant dense<0.000000e+00> : vector<8xf32>
    %27 = vector.multi_reduction <add>, %26, %cst_11 [1] : vector<8x128xf32> to vector<8xf32>
    %28 = vector.shape_cast %27 : vector<8xf32> to vector<8x1xf32>
    %29 = vector.extract_strided_slice %8 {offsets = [0, 128], sizes = [8, 128], strides = [1, 1]} : vector<8x512xf32> to vector<8x128xf32>
    %30 = vector.broadcast %28 : vector<8x1xf32> to vector<8x128xf32>
    %31 = arith.mulf %29, %30 : vector<8x128xf32>
    %c2_i32 = arith.constant 2 : i32
    %32 = arith.addi %11, %c2_i32 : i32
    %33 = vector.broadcast %32 : i32 to vector<8x128xi32>
    %34 = arith.cmpi eq, %10, %33 : vector<8x128xi32>
    %cst_12 = arith.constant 0.000000e+00 : f32
    %35 = vector.broadcast %cst_12 : f32 to vector<8x128xf32>
    %36 = arith.select %34, %9, %35 : vector<8x128xi1>, vector<8x128xf32>
    %cst_13 = arith.constant dense<0.000000e+00> : vector<8xf32>
    %37 = vector.multi_reduction <add>, %36, %cst_13 [1] : vector<8x128xf32> to vector<8xf32>
    %38 = vector.shape_cast %37 : vector<8xf32> to vector<8x1xf32>
    %39 = vector.extract_strided_slice %8 {offsets = [0, 256], sizes = [8, 128], strides = [1, 1]} : vector<8x512xf32> to vector<8x128xf32>
    %40 = vector.broadcast %38 : vector<8x1xf32> to vector<8x128xf32>
    %41 = arith.mulf %39, %40 : vector<8x128xf32>
    %c3_i32 = arith.constant 3 : i32
    %42 = arith.addi %11, %c3_i32 : i32
    %43 = vector.broadcast %42 : i32 to vector<8x128xi32>
    %44 = arith.cmpi eq, %10, %43 : vector<8x128xi32>
    %cst_14 = arith.constant 0.000000e+00 : f32
    %45 = vector.broadcast %cst_14 : f32 to vector<8x128xf32>
    %46 = arith.select %44, %9, %45 : vector<8x128xi1>, vector<8x128xf32>
    %cst_15 = arith.constant dense<0.000000e+00> : vector<8xf32>
    %47 = vector.multi_reduction <add>, %46, %cst_15 [1] : vector<8x128xf32> to vector<8xf32>
    %48 = vector.shape_cast %47 : vector<8xf32> to vector<8x1xf32>
    %49 = vector.extract_strided_slice %8 {offsets = [0, 384], sizes = [8, 128], strides = [1, 1]} : vector<8x512xf32> to vector<8x128xf32>
    %50 = vector.broadcast %48 : vector<8x1xf32> to vector<8x128xf32>
    %51 = arith.mulf %49, %50 : vector<8x128xf32>
    %52 = tpu.concatenate %21, %31, %41, %51 in 1 : vector<8x128xf32>, vector<8x128xf32>, vector<8x128xf32>, vector<8x128xf32> -> vector<8x512xf32>
    %c0_16 = arith.constant 0 : index
    %c0_17 = arith.constant 0 : index
    %53 = vector.load %arg6[%c0_16, %c0_17] : memref<8x128xf32, #tpu.memory_space<vmem>>, vector<8x128xf32>
    %54 = arith.truncf %52 : vector<8x512xf32> to vector<8x512xbf16>
    %c0_18 = arith.constant 0 : index
    %c0_19 = arith.constant 0 : index
    %55 = vector.load %arg5[%c0_18, %c0_19] : memref<512x128xbf16, #tpu.memory_space<vmem>>, vector<512x128xbf16>
    %cst_20 = arith.constant dense<0.000000e+00> : vector<8x128xf32>
    %56 = tpu.matmul %54, %55, %cst_20 {dimension_numbers = #tpu.dot_dimension_numbers<[1], [0], [0], [1], [0, 0, 1, 1], [], []>} : vector<8x512xbf16>, vector<512x128xbf16>, vector<8x128xf32> -> vector<8x128xf32>
    %57 = arith.addf %53, %56 : vector<8x128xf32>
    %c0_21 = arith.constant 0 : index
    %c0_22 = arith.constant 0 : index
    %58 = vector.load %arg6[%c0_21, %c0_22] : memref<8x128xf32, #tpu.memory_space<vmem>>, vector<8x128xf32>
    tpu.vector_store %arg6[%c0_21, %c0_22], %57 {strides = array<i32>} : memref<8x128xf32, #tpu.memory_space<vmem>>, vector<8x128xf32>,
    return
  }
  func.func @transform_0(%arg0: i32, %arg1: i32) -> (i32, i32) {
    %c0_i32 = arith.constant 0 : i32
    %c0_i32_0 = arith.constant 0 : i32
    return %arg0, %c0_i32 : i32, i32
  }
  func.func @transform_1(%arg0: i32, %arg1: i32) -> (i32, i32) {
    %c0_i32 = arith.constant 0 : i32
    %c0_i32_0 = arith.constant 0 : i32
    %c0_i32_1 = arith.constant 0 : i32
    return %c0_i32, %c0_i32_0 : i32, i32
  }
  func.func @transform_2(%arg0: i32, %arg1: i32) -> (i32, i32) {
    %c0_i32 = arith.constant 0 : i32
    %c0_i32_0 = arith.constant 0 : i32
    return %c0_i32, %arg1 : i32, i32
  }
  func.func @transform_3(%arg0: i32, %arg1: i32) -> (i32, i32) {
    %c0_i32 = arith.constant 0 : i32
    %c0_i32_0 = arith.constant 0 : i32
    return %arg1, %c0_i32 : i32, i32
  }
  func.func @transform_4(%arg0: i32, %arg1: i32) -> (i32, i32) {
    %c0_i32 = arith.constant 0 : i32
    %c0_i32_0 = arith.constant 0 : i32
    return %arg0, %c0_i32 : i32, i32
  }
  func.func @transform_5(%arg0: i32, %arg1: i32) -> (i32, i32) {
    %c0_i32 = arith.constant 0 : i32
    %c0_i32_0 = arith.constant 0 : i32
    return %arg0, %c0_i32 : i32, i32
  }
  func.func @transform_6(%arg0: i32, %arg1: i32) -> (i32, i32, i32) {
    %c0_i32 = arith.constant 0 : i32
    %c0_i32_0 = arith.constant 0 : i32
    %c0_i32_1 = arith.constant 0 : i32
    return %arg0, %c0_i32, %c0_i32_0 : i32, i32, i32
  }
}

</mosaic_0001>

<bundles_post_ra>
// kernel: _forward_core.3
= control target key start
LH: loop header
LB: loop body
LE: loop exit
PB: predicated region body
PF: predicated region fallthrough
CT: control target
= control target key end

     0   :  { %s1709_s21 = smov 0   ;;  %s1711_s22 = smov 0   ;;  %s1965_s0 = inlined_call_operand.vmem [shape: f32[8,128], index: 0, kind: input, shape index: {}, may-alias: {0,4}]   ;;  %s1966_s1 = inlined_call_operand.vmem [shape: bf16[128,128], index: 1, kind: input, shape index: {}]   ;;  %s1967_s2 = inlined_call_operand.vmem [shape: bf16[128,1024], index: 2, kind: input, shape index: {}]   ;;  %s1968_s3 = inlined_call_operand.vmem [shape: bf16[1024,128], index: 3, kind: input, shape index: {}]   ;;  %s1969_s4 = inlined_call_operand.vmem [shape: f32[8,128], index: 4, kind: output, shape index: {0}, may-alias: {0,4}]   ;;  %s1970_s5 = inlined_call_operand.vmem [shape: f32[8,128], index: 5, kind: output, shape index: {1}]   ;;  %s1971_s6 = inlined_call_operand.vmem [shape: f32[1,1,128], index: 6, kind: output, shape index: {2}]  }
   0x1   :  { %s1713_s23 = smov 0   ;;  %s1715_s24 = smov 0  }
   0x2   :  { %s1717_s25 = smov 0  }
   0x3 LB: > { %s26_s26 = sadd.s32 1, %s1665_s24  ;;  %p90_p1 = scmp.ne.s32.totalorder %s1657_s22, %s1653_s21  ;;  %s1669_s25 = sphi %s1717_s25, %s17_s25   ;;  %s1665_s24 = sphi %s1715_s24, %s1977_s24   ;;  %s1661_s23 = sphi %s1713_s23, %s1976_s23   ;;  %s1657_s22 = sphi %s1711_s22, %s1975_s22   ;;  %s1653_s21 = sphi %s1709_s21, %s1974_s21  }
   0x4   : > { %p27_p0 = scmp.ge.s32.totalorder %s26_s26, 2  ;;  %p91_p2 = scmp.eq.s32.totalorder %s1669_s25, 0 }
   0x5   : > { %s83_s28 = sadd.s32 1, %s1657_s22  ;;  %p1335_p5 = scmp.ge.s32.totalorder %s1669_s25, 2 }
   0x6   : > { %s1979_s26 = smov (%p27_p0, %s26_s26), 0  ;;  %p92_p3 = por %p91_p2, %p90_p1 }
   0x7   : > { %s80_s27 = ssub.s32 %s1665_s24, %s1979_s26  ;;  %230 = sbr.rel (%p1335_p5) target bundleno = 32 (0x20), region = 24 }
   0x8   : > { %p81_p4 = scmp.eq.s32.totalorder %s80_s27, 0 }
   0xa   : > { %s1744_s29 = scalar_select %p81_p4, %s1657_s22, %s83_s28  }
   0xc   : > { %233 = sbr.rel (!%p92_p3) target bundleno = 32 (0x20), region = 28  ;;  %s235_s30 = sand.u32 (%p92_p3), 1, %s1657_s22  }
   0xd   : > { %s1422_s7 = sshll.u32 (%p92_p3), %s1665_s24, 4  ;;  %s1336_s8 = sshll.u32 (%p92_p3), %s235_s30, 8 }
   0xe   : > { %s1752_s11 = scalar_lea.vmem (%p92_p3), %s1967_s2, %s1422_s7  ;;  %s1757_s12 = scalar_lea.vmem (%p92_p3), [#allocation3], %s1336_s8 }
   0xf   : > { %v253_v0 = vld [vmem:[%s1752_s11] sm:$0xff] (%p92_p3)  ;;  %v255_v1 = vld [vmem:[%s1752_s11 + $0x8] sm:$0xff] (%p92_p3) }
  0x10   : > { %v257_v2 = vld [vmem:[%s1752_s11 + $0x20] sm:$0xff] (%p92_p3)  ;;  %254 = vst [vmem:[%s1757_s12] sm:$0xff] (%p92_p3), %v253_v0  ;;  %256 = vst [vmem:[%s1757_s12 + $0x8] sm:$0xff] (%p92_p3), %v255_v1  ;;  %v259_v3 = vld [vmem:[%s1752_s11 + $0x28] sm:$0xff] (%p92_p3) }
  0x11   : > { %258 = vst [vmem:[%s1757_s12 + $0x10] sm:$0xff] %v257_v2  ;;  %v261_v4 = vld [vmem:[%s1752_s11 + $0x40] sm:$0xff]  ;;  %v263_v5 = vld [vmem:[%s1752_s11 + $0x48] sm:$0xff]  ;;  %260 = vst [vmem:[%s1757_s12 + $0x18] sm:$0xff] %v259_v3 }
  0x12   : > { %262 = vst [vmem:[%s1757_s12 + $0x20] sm:$0xff] %v261_v4  ;;  %264 = vst [vmem:[%s1757_s12 + $0x28] sm:$0xff] %v263_v5  ;;  %v265_v6 = vld [vmem:[%s1752_s11 + $0x60] sm:$0xff]  ;;  %v267_v7 = vld [vmem:[%s1752_s11 + $0x68] sm:$0xff] }
  0x13   : > { %v269_v8 = vld [vmem:[%s1752_s11 + $0x80] sm:$0xff]  ;;  %266 = vst [vmem:[%s1757_s12 + $0x30] sm:$0xff] %v265_v6  ;;  %268 = vst [vmem:[%s1757_s12 + $0x38] sm:$0xff] %v267_v7  ;;  %v271_v9 = vld [vmem:[%s1752_s11 + $0x88] sm:$0xff] }
  0x14   : > { %270 = vst [vmem:[%s1757_s12 + $0x40] sm:$0xff] %v269_v8  ;;  %v273_v10 = vld [vmem:[%s1752_s11 + $0xa0] sm:$0xff]  ;;  %v275_v11 = vld [vmem:[%s1752_s11 + $0xa8] sm:$0xff]  ;;  %272 = vst [vmem:[%s1757_s12 + $0x48] sm:$0xff] %v271_v9 }
  0x15   : > { %274 = vst [vmem:[%s1757_s12 + $0x50] sm:$0xff] %v273_v10  ;;  %276 = vst [vmem:[%s1757_s12 + $0x58] sm:$0xff] %v275_v11  ;;  %v277_v12 = vld [vmem:[%s1752_s11 + $0xc0] sm:$0xff]  ;;  %v279_v13 = vld [vmem:[%s1752_s11 + $0xc8] sm:$0xff] }
  0x16   : > { %v281_v14 = vld [vmem:[%s1752_s11 + $0xe0] sm:$0xff]  ;;  %278 = vst [vmem:[%s1757_s12 + $0x60] sm:$0xff] %v277_v12  ;;  %280 = vst [vmem:[%s1757_s12 + $0x68] sm:$0xff] %v279_v13  ;;  %v283_v15 = vld [vmem:[%s1752_s11 + $0xe8] sm:$0xff] }
  0x17   : > { %282 = vst [vmem:[%s1757_s12 + $0x70] sm:$0xff] %v281_v14  ;;  %v285_v16 = vld [vmem:[%s1752_s11 + $0x100] sm:$0xff]  ;;  %v287_v17 = vld [vmem:[%s1752_s11 + $0x108] sm:$0xff]  ;;  %284 = vst [vmem:[%s1757_s12 + $0x78] sm:$0xff] %v283_v15 }
  0x18   : > { %286 = vst [vmem:[%s1757_s12 + $0x80] sm:$0xff] %v285_v16  ;;  %288 = vst [vmem:[%s1757_s12 + $0x88] sm:$0xff] %v287_v17  ;;  %v289_v18 = vld [vmem:[%s1752_s11 + $0x120] sm:$0xff]  ;;  %v291_v19 = vld [vmem:[%s1752_s11 + $0x128] sm:$0xff] }
  0x19   : > { %v293_v20 = vld [vmem:[%s1752_s11 + $0x140] sm:$0xff]  ;;  %290 = vst [vmem:[%s1757_s12 + $0x90] sm:$0xff] %v289_v18  ;;  %292 = vst [vmem:[%s1757_s12 + $0x98] sm:$0xff] %v291_v19  ;;  %v295_v21 = vld [vmem:[%s1752_s11 + $0x148] sm:$0xff] }
  0x1a   : > { %294 = vst [vmem:[%s1757_s12 + $0xa0] sm:$0xff] %v293_v20  ;;  %v297_v22 = vld [vmem:[%s1752_s11 + $0x160] sm:$0xff]  ;;  %v299_v23 = vld [vmem:[%s1752_s11 + $0x168] sm:$0xff]  ;;  %296 = vst [vmem:[%s1757_s12 + $0xa8] sm:$0xff] %v295_v21 }
  0x1b   : > { %298 = vst [vmem:[%s1757_s12 + $0xb0] sm:$0xff] %v297_v22  ;;  %300 = vst [vmem:[%s1757_s12 + $0xb8] sm:$0xff] %v299_v23  ;;  %v301_v24 = vld [vmem:[%s1752_s11 + $0x180] sm:$0xff]  ;;  %v303_v25 = vld [vmem:[%s1752_s11 + $0x188] sm:$0xff] }
  0x1c   : > { %v305_v26 = vld [vmem:[%s1752_s11 + $0x1a0] sm:$0xff]  ;;  %302 = vst [vmem:[%s1757_s12 + $0xc0] sm:$0xff] %v301_v24  ;;  %304 = vst [vmem:[%s1757_s12 + $0xc8] sm:$0xff] %v303_v25  ;;  %v307_v27 = vld [vmem:[%s1752_s11 + $0x1a8] sm:$0xff] }
  0x1d   : > { %306 = vst [vmem:[%s1757_s12 + $0xd0] sm:$0xff] %v305_v26  ;;  %v309_v28 = vld [vmem:[%s1752_s11 + $0x1c0] sm:$0xff]  ;;  %v311_v29 = vld [vmem:[%s1752_s11 + $0x1c8] sm:$0xff]  ;;  %308 = vst [vmem:[%s1757_s12 + $0xd8] sm:$0xff] %v307_v27 }
  0x1e   : > { %310 = vst [vmem:[%s1757_s12 + $0xe0] sm:$0xff] %v309_v28  ;;  %312 = vst [vmem:[%s1757_s12 + $0xe8] sm:$0xff] %v311_v29  ;;  %v313_v30 = vld [vmem:[%s1752_s11 + $0x1e0] sm:$0xff]  ;;  %v315_v31 = vld [vmem:[%s1752_s11 + $0x1e8] sm:$0xff] }
  0x1f   : > { %314 = vst [vmem:[%s1757_s12 + $0xf0] sm:$0xff] %v313_v30  ;;  %316 = vst [vmem:[%s1757_s12 + $0xf8] sm:$0xff] %v315_v31 }
  0x20 PF: > { %p1339_p6 = scmp.ge.s32.totalorder %s1669_s25, 1  ;;  %p330_p7 = scmp.lt.s32.totalorder %s1669_s25, 3 }
  0x22   : > { %p331_p8 = pnand %p1339_p6, %p330_p7 }
  0x23   : > { %s337_s13 = sand.u32 (!%p331_p8), 1, %s1653_s21   ;;  %s1341_s14 = sshll.u32 (!%p331_p8), %s1661_s23, 6 }
  0x24   : > { %334 = sbr.rel (%p331_p8) target bundleno = 1035 (0x40b), region = 55  ;;  %s1340_s17 = sshll.u32 (!%p331_p8), %s337_s13, 8 }
  0x25   : > { %p387_p9 = scmp.lt.s32.totalorder (!%p331_p8), %s1341_s14, 127  ;;  %s1834_s28 = scalar_lea.vmem (!%p331_p8), [#allocation3], %s1340_s17 }
  0x26   : > { %p1343_p10 = scmp.ne.s32.totalorder (!%p331_p8), %s1661_s23, 0 }
  0x29   : > { %v404_v32 = vld [vmem:[%s1965_s0] sm:$0xff]  ;;  %s1981_s14 = smov (!%p387_p9, %s1341_s14), 127  ;;  %409 = sbr.rel (%p1343_p10) target bundleno = 597 (0x255), region = 63 }
  0x2a   : > { %v1827_v33 = vpack.c.bf16 %v404_v32, %v404_v32  ;;  %s1342_s18 = sshll.u32 %s1981_s14, 2 }
  0x2b   : > { %s1832_s27 = scalar_lea.vmem %s1968_s3, %s1342_s18 }
  0x2e   : > { %v1539_v34 = vld [vmem:[%s1966_s1 + $0x38] sm:$0xff]   ;;  %537 = vst [vmem:[%s1969_s4] sm:$0xff] %v404_v32  ;;  %v1671_v35 = vmov 0.0   ;;  %v1540_v36 = vld [vmem:[%s1966_s1 + $0x30] sm:$0xff]   ;;  %vm1672_vm0 = vmmov 0   ;;  %v1541_v37 = vld [vmem:[%s1966_s1 + $0x28] sm:$0xff]   ;;  %v515_v43 = vlaneseq }
  0x2f   : > { %1476 = vmatprep.subr.bf16.mxu0 %v1671_v35  ;;  %1492 = vmatprep.mubr.msk.bf16.mxu0 %vm1672_vm0, %v1671_v35  ;;  %v1542_v38 = vld [vmem:[%s1966_s1 + $0x20] sm:$0xff]   ;;  %v1543_v39 = vld [vmem:[%s1966_s1 + $0x18] sm:$0xff]   ;;  %v1544_v40 = vld [vmem:[%s1966_s1 + $0x10] sm:$0xff]  }
  0x30   : > { %1477 = vmatpush3.bf16.msra.mxu0 %v1539_v34  ;;  %v1545_v41 = vld [vmem:[%s1966_s1 + $0x8] sm:$0xff]   ;;  %v1546_v42 = vld [vmem:[%s1966_s1] sm:$0xff]   ;;  %v516_v44 = vand.u32 127, %v515_v43 }
  0x31   : > { %1478 = vmatprep.subr.bf16.mxu0 %v1671_v35 }
  0x32   : > { %vm517_vm1 = vcmp.lt.s32.totalorder %v516_v44, 8 }
  0x34   : > { %1479 = vmatpush3.bf16.msra.mxu0 %v1540_v36 }
  0x35   : > { %1480 = vmatprep.subr.bf16.mxu0 %v1671_v35 }
  0x38   : > { %1481 = vmatpush3.bf16.msra.mxu0 %v1541_v37 }
  0x39   : > { %1482 = vmatprep.subr.bf16.mxu0 %v1671_v35 }
  0x3c   : > { %1483 = vmatpush3.bf16.msra.mxu0 %v1542_v38 }
  0x3d   : > { %1484 = vmatprep.subr.bf16.mxu0 %v1671_v35 }
  0x40   : > { %1485 = vmatpush3.bf16.msra.mxu0 %v1543_v39 }
  0x41   : > { %1486 = vmatprep.subr.bf16.mxu0 %v1671_v35 }
  0x44   : > { %1487 = vmatpush3.bf16.msra.mxu0 %v1544_v40 }
  0x45   : > { %1488 = vmatprep.subr.bf16.mxu0 %v1671_v35 }
  0x48   : > { %1489 = vmatpush3.bf16.msra.mxu0 %v1545_v41 }
  0x49   : > { %1490 = vmatprep.subr.bf16.mxu0 %v1671_v35 }
  0x4c   : > { %1491 = vmatpush3.bf16.msra.mxu0 %v1546_v42 }
  0x4f   : > { %1493 = vmatmul.mubr.bf16.vlgmr.msra.gmra.mxu0 %v1827_v33 }
 0x10f   : > { %v508_v45 = vpop.f32.mrf.mxu0 }
 0x110   : > { %514 = vst [vmem:[%s1970_s5] sm:$0xff] %v508_v45  ;;  %v518_v46 = vsel %vm517_vm1, %v508_v45, -1e+30 }
 0x111   : > { %519 = vmax.xlane.f32.xlu0 %v518_v46  ;;  %v1494_v47 = vpop.f32.mrf.mxu0 }
 0x113   : > { %v511_v48 = vpop.f32.mrf.mxu0 }
 0x115   : > { %v1495_v49 = vpop.f32.mrf.mxu0 }
 0x19a   : > { %v520_v50 = vpop.xlane.xlu0 %519 }
 0x19b   : > { %v521_v51 = vsub.f32 %v518_v46, %v520_v50 }
 0x19d   : > { %v522_v52 = vmul.f32 1.442695, %v521_v51 }
 0x19f   : > { %1547 = vpow2.f32 %v522_v52 }
 0x1ac   : > { %v1548_v53 = vpop.eup %1547 }
 0x1ad   : > { %v524_v54 = vsel %vm517_vm1, %v1548_v53, 0.0 }
 0x1ae   : > { %525 = vadd.xlane.f32.xlu0 %v524_v54 }
 0x237   : > { %v526_v55 = vpop.xlane.xlu0 %525 }
 0x238   : > { %1549 = vrcp.f32 %v526_v55 }
 0x245   : > { %v1550_v56 = vpop.eup %1549 }
 0x246   : > { %v528_v57 = vmul.f32 %v1550_v56, %v524_v54 }
 0x248   : > { %529 = vst [vmem:[#allocation2] sm:$0xff] %v528_v57  ;;  %v530_v58 = vrot.slane %v528_v57, 4 }
 0x24a   : > { %v531_v59 = vadd.f32 %v530_v58, %v528_v57 }
 0x24c   : > { %v532_v60 = vrot.slane %v531_v59, 2 }
 0x24e   : > { %v533_v61 = vadd.f32 %v532_v60, %v531_v59 }
 0x250   : > { %v534_v62 = vrot.slane %v533_v61, 1 }
 0x252   : > { %v535_v63 = vadd.f32 %v534_v62, %v533_v61 }
 0x254   : > { %536 = vst [vmem:[%s1971_s6] sm:$0x1] %v535_v63 }
 0x255 PF: > { %v1551_v0 = vld [vmem:[%s1834_s28 + $0xe4] ss:$16 sps:$4 sm:$0xff]   ;;  %v1553_v1 = vld [vmem:[%s1834_s28 + $0xec] ss:$16 sps:$4 sm:$0xff]   ;;  %v1673_v2 = vmov 0   ;;  %s1384_s11 = sshll.u32 %s1661_s23, 2  ;;  %v817_v16 = vlaneseq }
 0x256   : > { %762 = vmatprep.mubr.bf16.mxu0 %v1673_v2  ;;  %803 = vmatprep.mubr.bf16.mxu1 %v1673_v2  ;;  %v1555_v3 = vld [vmem:[%s1834_s28 + $0xe0] ss:$16 sps:$4 sm:$0xff]   ;;  %v1556_v4 = vld [vmem:[%s1834_s28 + $0xe8] ss:$16 sps:$4 sm:$0xff]   ;;  %v1557_v5 = vld [vmem:[%s1834_s28 + $0xc4] ss:$16 sps:$4 sm:$0xff]   ;;  %v820_v23 = vstv %s1384_s11 }
 0x257   : > { %730 = vmatprep.subr.bf16.mxu0 %v1551_v0  ;;  %771 = vmatprep.subr.bf16.mxu1 %v1553_v1  ;;  %v1559_v6 = vld [vmem:[%s1834_s28 + $0xcc] ss:$16 sps:$4 sm:$0xff]   ;;  %v1561_v7 = vld [vmem:[%s1834_s28 + $0xc0] ss:$16 sps:$4 sm:$0xff]   ;;  %v1562_v8 = vld [vmem:[%s1834_s28 + $0xc8] ss:$16 sps:$4 sm:$0xff]  }
 0x258   : > { %731 = vmatpush1.bf16.msra.mxu0 %v1555_v3  ;;  %772 = vmatpush1.bf16.msra.mxu1 %v1556_v4  ;;  %v1563_v9 = vld [vmem:[%s1834_s28 + $0xa4] ss:$16 sps:$4 sm:$0xff]   ;;  %v1565_v10 = vld [vmem:[%s1834_s28 + $0xac] ss:$16 sps:$4 sm:$0xff]   ;;  %v1567_v11 = vld [vmem:[%s1834_s28 + $0xa0] ss:$16 sps:$4 sm:$0xff]  }
 0x259   : > { %732 = vmatprep.subr.bf16.mxu0 %v1557_v5  ;;  %773 = vmatprep.subr.bf16.mxu1 %v1559_v6  ;;  %v1568_v12 = vld [vmem:[%s1834_s28 + $0xa8] ss:$16 sps:$4 sm:$0xff]   ;;  %v1569_v13 = vld [vmem:[%s1834_s28 + $0x84] ss:$16 sps:$4 sm:$0xff]   ;;  %v1571_v14 = vld [vmem:[%s1834_s28 + $0x8c] ss:$16 sps:$4 sm:$0xff]  }
 0x25a   : > { %v1573_v15 = vld [vmem:[%s1834_s28 + $0x80] ss:$16 sps:$4 sm:$0xff]   ;;  %v1574_v17 = vld [vmem:[%s1834_s28 + $0x88] ss:$16 sps:$4 sm:$0xff]   ;;  %v1575_v18 = vld [vmem:[%s1834_s28 + $0x64] ss:$16 sps:$4 sm:$0xff]  }
 0x25b   : > { %v1577_v19 = vld [vmem:[%s1834_s28 + $0x6c] ss:$16 sps:$4 sm:$0xff]   ;;  %s826_s12 = sadd.s32 1, %s1384_s11  ;;  %s833_s13 = sadd.s32 2, %s1384_s11  ;;  %v1579_v20 = vld [vmem:[%s1834_s28 + $0x60] ss:$16 sps:$4 sm:$0xff]  }
 0x25c   : > { %733 = vmatpush1.bf16.msra.mxu0 %v1561_v7  ;;  %774 = vmatpush1.bf16.msra.mxu1 %v1562_v8  ;;  %v1580_v21 = vld [vmem:[%s1834_s28 + $0x68] ss:$16 sps:$4 sm:$0xff]   ;;  %v818_v22 = vand.u32 127, %v817_v16  ;;  %s840_s23 = sadd.s32 3, %s1384_s11  ;;  %v1581_v24 = vld [vmem:[%s1834_s28 + $0x44] ss:$16 sps:$4 sm:$0xff]   ;;  %v827_v25 = vstv %s826_s12  ;;  %v834_v27 = vstv %s833_s13 }
 0x25d   : > { %734 = vmatprep.subr.bf16.mxu0 %v1563_v9  ;;  %775 = vmatprep.subr.bf16.mxu1 %v1565_v10  ;;  %v1583_v26 = vld [vmem:[%s1834_s28 + $0x4c] ss:$16 sps:$4 sm:$0xff]   ;;  %v841_v28 = vstv %s840_s23  ;;  %v1585_v29 = vld [vmem:[%s1834_s28 + $0x40] ss:$16 sps:$4 sm:$0xff]   ;;  %v1586_v31 = vld [vmem:[%s1834_s28 + $0x48] ss:$16 sps:$4 sm:$0xff]  }
 0x25e   : > { %vm1895_vm2 = vcmp.eq.s32.totalorder %v818_v22, %v820_v23  ;;  %vm828_vm3 = vcmp.eq.s32.totalorder %v818_v22, %v827_v25  ;;  %v1587_v32 = vld [vmem:[%s1834_s28 + $0x24] ss:$16 sps:$4 sm:$0xff]   ;;  %v1589_v34 = vld [vmem:[%s1834_s28 + $0x2c] ss:$16 sps:$4 sm:$0xff]   ;;  %vm835_vm4 = vcmp.eq.s32.totalorder %v818_v22, %v834_v27  ;;  %vm842_vm5 = vcmp.eq.s32.totalorder %v818_v22, %v841_v28  ;;  %v1591_v36 = vld [vmem:[%s1834_s28 + $0x20] ss:$16 sps:$4 sm:$0xff]  }
 0x25f   : > { %v816_v35 = vld [vmem:[#allocation2] sm:$0xff]  ;;  %v1593_v40 = vld [vmem:[%s1834_s28 + $0x4] ss:$16 sps:$4 sm:$0xff]   ;;  %v1597_v44 = vld [vmem:[%s1834_s28] ss:$16 sps:$4 sm:$0xff]  }
 0x260   : > { %735 = vmatpush1.bf16.msra.mxu0 %v1567_v11  ;;  %776 = vmatpush1.bf16.msra.mxu1 %v1568_v12  ;;  %v1592_v37 = vld [vmem:[%s1834_s28 + $0x28] ss:$16 sps:$4 sm:$0xff]   ;;  %v822_v38 = vsel %vm1895_vm2, %v816_v35, 0.0  ;;  %v829_v39 = vsel %vm828_vm3, %v816_v35, 0.0  ;;  %v836_v41 = vsel %vm835_vm4, %v816_v35, 0.0  ;;  %v843_v42 = vsel %vm842_vm5, %v816_v35, 0.0 }
 0x261   : > { %736 = vmatprep.subr.bf16.mxu0 %v1569_v13  ;;  %777 = vmatprep.subr.bf16.mxu1 %v1571_v14  ;;  %v1595_v43 = vld [vmem:[%s1834_s28 + $0xc] ss:$16 sps:$4 sm:$0xff]   ;;  %v1598_v45 = vld [vmem:[%s1834_s28 + $0x8] ss:$16 sps:$4 sm:$0xff]   ;;  %v1599_v46 = vld [vmem:[%s1832_s27 + $0x78] sm:$0xff]  }
 0x262   : > { %823 = vadd.xlane.f32.xlu1 %v822_v38  ;;  %830 = vadd.xlane.f32.xlu0 %v829_v39  ;;  %v1600_v47 = vld [vmem:[%s1832_s27 + $0xf8] sm:$0xff]   ;;  %v1603_v50 = vld [vmem:[%s1832_s27 + $0x70] sm:$0xff]   ;;  %v1607_v54 = vld [vmem:[%s1832_s27 + $0x68] sm:$0xff]  }
 0x263   : > { %v1601_v48 = vld [vmem:[%s1832_s27 + $0x38] sm:$0xff]   ;;  %v1604_v51 = vld [vmem:[%s1832_s27 + $0xf0] sm:$0xff]   ;;  %v1608_v55 = vld [vmem:[%s1832_s27 + $0xe8] sm:$0xff]  }
 0x264   : > { %737 = vmatpush1.bf16.msra.mxu0 %v1573_v15  ;;  %778 = vmatpush1.bf16.msra.mxu1 %v1574_v17  ;;  %v1602_v49 = vld [vmem:[%s1832_s27 + $0xb8] sm:$0xff]   ;;  %v1605_v52 = vld [vmem:[%s1832_s27 + $0x30] sm:$0xff]   ;;  %v1609_v56 = vld [vmem:[%s1832_s27 + $0x28] sm:$0xff]  }
 0x265   : > { %738 = vmatprep.subr.bf16.mxu0 %v1575_v18  ;;  %779 = vmatprep.subr.bf16.mxu1 %v1577_v19  ;;  %v1606_v53 = vld [vmem:[%s1832_s27 + $0xb0] sm:$0xff]   ;;  %v1610_v57 = vld [vmem:[%s1832_s27 + $0xa8] sm:$0xff]   ;;  %v1612_v58 = vld [vmem:[%s1832_s27 + $0xe0] sm:$0xff]  }
 0x266   : > { %837 = vadd.xlane.f32.xlu1 %v836_v41  ;;  %844 = vadd.xlane.f32.xlu0 %v843_v42  ;;  %v1613_v59 = vld [vmem:[%s1832_s27 + $0x20] sm:$0xff]   ;;  %v1615_v61 = vld [vmem:[%s1832_s27 + $0x58] sm:$0xff]   ;;  %v1619_v1 = vld [vmem:[%s1832_s27 + $0x50] sm:$0xff]  }
 0x267   : > { %v1614_v60 = vld [vmem:[%s1832_s27 + $0xa0] sm:$0xff]   ;;  %v1616_v62 = vld [vmem:[%s1832_s27 + $0xd8] sm:$0xff]   ;;  %v1620_v2 = vld [vmem:[%s1832_s27 + $0xd0] sm:$0xff]  }
 0x268   : > { %739 = vmatpush1.bf16.msra.mxu0 %v1579_v20  ;;  %780 = vmatpush1.bf16.msra.mxu1 %v1580_v21  ;;  %v1617_v63 = vld [vmem:[%s1832_s27 + $0x18] sm:$0xff]   ;;  %v1621_v3 = vld [vmem:[%s1832_s27 + $0x10] sm:$0xff]   ;;  %v1623_v5 = vld [vmem:[%s1832_s27 + $0x48] sm:$0xff]  }
 0x269   : > { %740 = vmatprep.subr.bf16.mxu0 %v1581_v24  ;;  %781 = vmatprep.subr.bf16.mxu1 %v1583_v26  ;;  %v1618_v0 = vld [vmem:[%s1832_s27 + $0x98] sm:$0xff]   ;;  %v1622_v4 = vld [vmem:[%s1832_s27 + $0x90] sm:$0xff]   ;;  %v1624_v6 = vld [vmem:[%s1832_s27 + $0xc8] sm:$0xff]  }
 0x26a   : > { %v1625_v7 = vld [vmem:[%s1832_s27 + $0x8] sm:$0xff]   ;;  %v1627_v9 = vld [vmem:[%s1832_s27 + $0x40] sm:$0xff]  }
 0x26b   : > { %v1626_v8 = vld [vmem:[%s1832_s27 + $0x88] sm:$0xff]   ;;  %v1628_v10 = vld [vmem:[%s1832_s27 + $0xc0] sm:$0xff]  }
 0x26c   : > { %741 = vmatpush1.bf16.msra.mxu0 %v1585_v29  ;;  %782 = vmatpush1.bf16.msra.mxu1 %v1586_v31  ;;  %v1629_v11 = vld [vmem:[%s1832_s27] sm:$0xff]  }
 0x26d   : > { %742 = vmatprep.subr.bf16.mxu0 %v1587_v32  ;;  %783 = vmatprep.subr.bf16.mxu1 %v1589_v34  ;;  %v1630_v12 = vld [vmem:[%s1832_s27 + $0x80] sm:$0xff]  }
 0x270   : > { %743 = vmatpush1.bf16.msra.mxu0 %v1591_v36  ;;  %784 = vmatpush1.bf16.msra.mxu1 %v1592_v37 }
 0x271   : > { %744 = vmatprep.subr.bf16.mxu0 %v1593_v40  ;;  %785 = vmatprep.subr.bf16.mxu1 %v1595_v43 }
 0x274   : > { %745 = vmatpush1.bf16.msra.mxu0 %v1597_v44  ;;  %786 = vmatpush1.bf16.msra.mxu1 %v1598_v45  ;;  %v847_v44 = vld [vmem:[%s1969_s4] sm:$0xff] }
 0x275   : > { %1432 = vmatprep.subr.bf16.mxu0 %v1599_v46  ;;  %1454 = vmatprep.subr.bf16.mxu1 %v1600_v47 }
 0x277   : > { %763 = vmatmul.mubr.bf16.vlgmr.msra.gmra.mxu0 %v1827_v33  ;;  %804 = vmatmul.mubr.bf16.vlgmr.msra.gmra.mxu1 %v1827_v33  ;;  %v1611_v33 = vld [vmem:[%s1832_s27 + $0x60] sm:$0xff]  }
 0x278   : > { %1433 = vmatpush3.bf16.msra.mxu0 %v1601_v48  ;;  %1455 = vmatpush3.bf16.msra.mxu1 %v1602_v49 }
 0x279   : > { %1434 = vmatprep.subr.bf16.mxu0 %v1603_v50  ;;  %1456 = vmatprep.subr.bf16.mxu1 %v1604_v51 }
 0x27c   : > { %1435 = vmatpush3.bf16.msra.mxu0 %v1605_v52  ;;  %1457 = vmatpush3.bf16.msra.mxu1 %v1606_v53 }
 0x27d   : > { %1436 = vmatprep.subr.bf16.mxu0 %v1607_v54  ;;  %1458 = vmatprep.subr.bf16.mxu1 %v1608_v55 }
 0x280   : > { %1437 = vmatpush3.bf16.msra.mxu0 %v1609_v56  ;;  %1459 = vmatpush3.bf16.msra.mxu1 %v1610_v57 }
 0x281   : > { %1438 = vmatprep.subr.bf16.mxu0 %v1611_v33  ;;  %1460 = vmatprep.subr.bf16.mxu1 %v1612_v58 }
 0x284   : > { %1439 = vmatpush3.bf16.msra.mxu0 %v1613_v59  ;;  %1461 = vmatpush3.bf16.msra.mxu1 %v1614_v60 }
 0x285   : > { %1440 = vmatprep.subr.bf16.mxu0 %v1615_v61  ;;  %1462 = vmatprep.subr.bf16.mxu1 %v1616_v62 }
 0x288   : > { %1441 = vmatpush3.bf16.msra.mxu0 %v1617_v63  ;;  %1463 = vmatpush3.bf16.msra.mxu1 %v1618_v0 }
 0x289   : > { %1442 = vmatprep.subr.bf16.mxu0 %v1619_v1  ;;  %1464 = vmatprep.subr.bf16.mxu1 %v1620_v2 }
 0x28c   : > { %1443 = vmatpush3.bf16.msra.mxu0 %v1621_v3  ;;  %1465 = vmatpush3.bf16.msra.mxu1 %v1622_v4 }
 0x28d   : > { %1444 = vmatprep.subr.bf16.mxu0 %v1623_v5  ;;  %1466 = vmatprep.subr.bf16.mxu1 %v1624_v6 }
 0x290   : > { %1445 = vmatpush3.bf16.msra.mxu0 %v1625_v7  ;;  %1467 = vmatpush3.bf16.msra.mxu1 %v1626_v8 }
 0x291   : > { %1446 = vmatprep.subr.bf16.mxu0 %v1627_v9  ;;  %1468 = vmatprep.subr.bf16.mxu1 %v1628_v10 }
 0x294   : > { %1447 = vmatpush3.bf16.msra.mxu0 %v1629_v11  ;;  %1469 = vmatpush3.bf16.msra.mxu1 %v1630_v12 }
 0x2eb   : > { %v824_v13 = vpop.xlane.xlu1 %823  ;;  %v831_v14 = vpop.xlane.xlu0 %830 }
 0x2ef   : > { %v838_v19 = vpop.xlane.xlu1 %837  ;;  %v845_v20 = vpop.xlane.xlu0 %844 }
 0x337   : > { %v764_v15 = vpop.f32.mrf.mxu0  ;;  %v805_v16 = vpop.f32.mrf.mxu1 }
 0x338   : > { %v812_v17 = vmax.f32 %v764_v15, 0.0  ;;  %v814_v18 = vmax.f32 %v805_v16, 0.0 }
 0x339   : > { %v766_v21 = vpop.f32.mrf.mxu0  ;;  %v807_v22 = vpop.f32.mrf.mxu1 }
 0x33a   : > { %v813_v23 = vmax.f32 %v766_v21, 0.0  ;;  %v815_v24 = vmax.f32 %v807_v22, 0.0  ;;  %v825_v25 = vmul.f32 %v824_v13, %v812_v17  ;;  %v839_v26 = vmul.f32 %v838_v19, %v814_v18 }
 0x33b   : > { %v768_v27 = vpop.f32.mrf.mxu0  ;;  %v809_v28 = vpop.f32.mrf.mxu1 }
 0x33c   : > { %v832_v29 = vmul.f32 %v831_v14, %v813_v23  ;;  %v846_v30 = vmul.f32 %v845_v20, %v815_v24  ;;  %v848_v36 = vpack.c.bf16 %v825_v25, %v825_v25  ;;  %v850_v37 = vpack.c.bf16 %v839_v26, %v839_v26 }
 0x33d   : > { %v769_v31 = vpop.f32.mrf.mxu0  ;;  %v810_v32 = vpop.f32.mrf.mxu1 }
 0x33e   : > { %v849_v34 = vpack.c.bf16 %v832_v29, %v832_v29  ;;  %v851_v35 = vpack.c.bf16 %v846_v30, %v846_v30 }
 0x340   : > { %1140 = vmatprep.mubr.bf16.mxu0 %v849_v34  ;;  %1180 = vmatprep.mubr.bf16.mxu1 %v851_v35 }
 0x341   : > { %1141 = vmatmul.mubr.bf16.vlgmr.msra.gmra.mxu0 %v848_v36  ;;  %1181 = vmatmul.mubr.bf16.vlgmr.msra.gmra.mxu1 %v850_v37 }
 0x401   : > { %v1448_v38 = vpop.f32.mrf.mxu0  ;;  %v1470_v39 = vpop.f32.mrf.mxu1 }
 0x403   : > { %v1449_v40 = vpop.f32.mrf.mxu0  ;;  %v1471_v41 = vpop.f32.mrf.mxu1 }
 0x404   : > { %v1450_v42 = vadd.f32 %v1449_v40, %v1448_v38  ;;  %v1472_v43 = vadd.f32 %v1471_v41, %v1470_v39 }
 0x405   : > { %v1451_v45 = vpop.f32.mrf.mxu0  ;;  %v1473_v46 = vpop.f32.mrf.mxu1 }
 0x406   : > { %v1183_v47 = vadd.f32 %v1472_v43, %v1450_v42 }
 0x407   : > { %v1452_v48 = vpop.f32.mrf.mxu0  ;;  %v1474_v49 = vpop.f32.mrf.mxu1 }
 0x408   : > { %v1188_v50 = vadd.f32 %v1183_v47, %v847_v44 }
 0x40a   : > { %1189 = vst [vmem:[%s1969_s4] sm:$0xff] %v1188_v50 }
 0x40b PF: > { %s17_s25 = sadd.s32 1, %s1669_s25   ;;  %s1974_s21 = smov %s1657_s22 }
 0x40c   : > { %p14_p11 = scmp.ge.s32.totalorder %s17_s25, 4   ;;  %s1975_s22 = smov %s1744_s29 }
 0x40d   : > { %s1976_s23 = smov %s1665_s24  ;;  %s1977_s24 = smov %s1979_s26 }
 0x40e   :  { %16 = sbr.rel (!%p14_p11) target bundleno = 3 (0x3), region = 128 }

// kernel: _forward_core.2
= control target key start
LH: loop header
LB: loop body
LE: loop exit
PB: predicated region body
PF: predicated region fallthrough
CT: control target
= control target key end

     0   :  { %s2036_s0 = inlined_call_operand.vmem [shape: f32[8,128], index: 0, kind: input, shape index: {}, may-alias: {0,4}]   ;;  %s2037_s1 = inlined_call_operand.vmem [shape: bf16[128,128], index: 1, kind: input, shape index: {}]   ;;  %s2038_s2 = inlined_call_operand.hbm [shape: bf16[128,1024], index: 2, kind: input, shape index: {}]   ;;  %s2039_s3 = inlined_call_operand.hbm [shape: bf16[1024,128], index: 3, kind: input, shape index: {}]   ;;  %s2040_s4 = inlined_call_operand.vmem [shape: f32[8,128], index: 4, kind: output, shape index: {0}, may-alias: {0,4}]   ;;  %s2041_s5 = inlined_call_operand.vmem [shape: f32[8,128], index: 5, kind: output, shape index: {1}]   ;;  %s2042_s6 = inlined_call_operand.vmem [shape: f32[1,1,128], index: 6, kind: output, shape index: {2}]  }
   0x1   :  { %2044 = sst [smem:[#allocation10_spill]] %s2038_s2 }
   0x2   :  { %12 = vsyncpa [#allocation4], 0 }
   0x3   :  { %14 = vsyncpa [#allocation4 + $0x1], 0 }
   0x4   :  { %15 = vsyncpa [#allocation6], 0 }
   0x5   :  { %17 = vsyncpa [#allocation6 + $0x1], 0  ;;  %s1789_s21 = smov 0   ;;  %s1791_s22 = smov 0  }
   0x6   :  { %s1793_s23 = smov 0   ;;  %s1795_s24 = smov 0  }
   0x7   :  { %s1797_s25 = smov 0   ;;  %s1799_s26 = smov 0  }
   0x8 LB: > { %s1305_s27 = sadd.s32 4294967295, %s1742_s26   ;;  %s32_s28 = sadd.s32 1, %s1738_s25  ;;  %s1742_s26 = sphi %s1799_s26, %s23_s26   ;;  %s1738_s25 = sphi %s1797_s25, %s2058_s25   ;;  %s1734_s24 = sphi %s1795_s24, %s2057_s24   ;;  %s1730_s23 = sphi %s1793_s23, %s2056_s23   ;;  %s1726_s22 = sphi %s1791_s22, %s2055_s22   ;;  %s1722_s21 = sphi %s1789_s21, %s2054_s21  }
   0x9   : > { %p33_p0 = scmp.ge.s32.totalorder %s32_s28, 2  ;;  %s89_s29 = sadd.s32 1, %s1730_s23 }
   0xa   : > { %p96_p1 = scmp.ne.s32.totalorder %s1730_s23, %s1726_s22  ;;  %p97_p2 = scmp.eq.s32.totalorder %s1742_s26, 0 }
   0xb   : > { %s2060_s28 = smov (%p33_p0, %s32_s28), 0  ;;  %p102_p4 = scmp.ne.s32.totalorder %s1726_s22, %s1722_s21 }
   0xc   : > { %2045 = sst [smem:[#allocation9_spill]] %s2060_s28  ;;  %p1825_p3 = por %p97_p2, %p96_p1 }
   0xd   : > { %s86_s7 = ssub.s32 %s1738_s25, %s2060_s28  ;;  %p103_p5 = scmp.eq.s32.totalorder %s1305_s27, 0 }
   0xe   : > { %p87_p6 = scmp.eq.s32.totalorder %s86_s7, 0  ;;  %p1483_p8 = scmp.lt.s32.totalorder %s1742_s26, 2 }
   0xf   : > { %p1832_p7 = por %p103_p5, %p102_p4  ;;  %s1841_s10 = sand.u32 1, %s1730_s23  }
  0x10   : > { %s1838_s9 = scalar_select %p87_p6, %s1730_s23, %s89_s29  }
  0x11   : > { %s1397_s11 = sshll.u32 %s1738_s25, 8  ;;  %s1309_s12 = sshll.u32 %s1841_s10, 8 }
  0x12   : > { %s2048_s2 = sld [smem:[#allocation10_spill]]  ;;  %s244_s16 = scalar_lea.vmem [#allocation3], %s1309_s12 }
  0x13   : > { %s251_s17 = sshll.u32 %s244_s16, 4  ;;  %p1852_p9 = pnand %p1483_p8, %p1825_p3  ;;  %s252_s17 = int_to_ptr.vmem [resolvable:$true] %s251_s17 }
  0x14   : > { %p1315_p10 = scmp.ge.s32.totalorder %s1742_s26, 1  ;;  %s241_s19 = scalar_lea.sflag [#allocation4], %s1841_s10 }
  0x15   : > { %p1634_p11 = pneg %p1852_p9  ;;  %s1645_s20 = scalar_lea.vmem %s252_s17, 4096 }
  0x16   : > { %p1646_p12 = scmp.ne.s32.totalorder %s252_s17, %s1645_s20  ;;  %s1744_s21 = smov [#allocation3]  }
  0x17   : > { %s1650_s27 = sshll.u32 %s1744_s21, 4  ;;  %s1651_s27 = int_to_ptr.vmem [resolvable:$false] %s1650_s27 }
  0x18   : > { %s250_s15 = scalar_lea.hbm %s2048_s2, %s1397_s11  ;;  %p1648_p13 = pnand %p1646_p12, %p1634_p11 }
  0x19   : > { %s1652_s29 = scalar_lea.vmem %s1651_s27, 8192  ;;  %p1653_p1 = scmp.lt.s32.totalorder %s252_s17, %s1651_s27 }
  0x1a   : > { %p1649_p0 = pneg %p1648_p13  ;;  %p1654_p2 = scmp.lt.s32.totalorder %s1652_s29, %s1645_s20 }
  0x1c   : > { %p1655_p3 = por %p1654_p2, %p1653_p1 }
  0x1e   : > { %p1656_p4 = pnand %p1655_p3, %p1649_p0 }
  0x20   : > { %1659 = shalt.err (!%p1656_p4)
}
  0x21   : > { %s1745_s30 = smov 512   ;;  %s1746_s7 = smov 256  }
  0x22   : > { %s1747_s11 = smov 16   ;;  %p280_p5 = scmp.lt.s32.totalorder %s1742_s26, 3 }
  0x23   : > { %1479 = dma.hbm_to_vmem [thread:$0]  (!%p1852_p9), %s250_s15, 4096, %s252_s17, %s241_s19, %s1745_s30, %s1746_s7, %s1747_s11  }
  0x24   : > { %s1398_s13 = sshll.u32 %s1738_s25, 12  ;;  %p1869_p6 = pnand %p1315_p10, %p280_p5 }
  0x25   : > { %s271_s21 = scalar_lea.hbm %s2039_s3, %s1398_s13  ;;  %s265_s27 = scalar_lea.vmem [#allocation5], %s1309_s12 }
  0x26   : > { %s272_s29 = sshll.u32 %s265_s27, 4  ;;  %s262_s2 = scalar_lea.sflag [#allocation6], %s1841_s10  ;;  %s273_s29 = int_to_ptr.vmem [resolvable:$true] %s272_s29 }
  0x27   : > { %s1673_s28 = scalar_lea.vmem %s273_s29, 4096  ;;  %s1748_s15 = smov [#allocation5]  }
  0x28   : > { %p1674_p8 = scmp.ne.s32.totalorder %s273_s29, %s1673_s28  ;;  %s1678_s17 = sshll.u32 %s1748_s15, 4  ;;  %s1679_s17 = int_to_ptr.vmem [resolvable:$false] %s1678_s17 }
  0x29   : > { %s1680_s19 = scalar_lea.vmem %s1679_s17, 8192  ;;  %p1681_p10 = scmp.lt.s32.totalorder %s273_s29, %s1679_s17 }
  0x2a   : > { %p1676_p12 = pnand %p1674_p8, %p1634_p11  ;;  %p1682_p0 = scmp.lt.s32.totalorder %s1680_s19, %s1673_s28 }
  0x2c   : > { %p1677_p13 = pneg %p1676_p12  ;;  %p1683_p1 = por %p1682_p0, %p1681_p10 }
  0x2e   : > { %p1684_p2 = pnand %p1683_p1, %p1677_p13 }
  0x30   : > { %1687 = shalt.err (!%p1684_p2)
}
  0x31   : > { %s1749_s30 = smov 64   ;;  %s1750_s12 = smov 4  }
  0x32   : > { %1482 = dma.hbm_to_vmem [thread:$0]  (!%p1852_p9), %s271_s21, 4096, %s273_s29, %s262_s2, %s1749_s30, %s1749_s30, %s1750_s12  }
  0x33   : > { %284 = sbr.rel (%p1869_p6) target bundleno = 1055 (0x41f), region = 36  ;;  %s286_s10 = sand.u32 (!%p1869_p6), 1, %s1726_s22  }
  0x34   : > { %s1316_s7 = sshll.u32 (!%p1869_p6), %s286_s10, 8  ;;  %s287_s11 = scalar_lea.sflag (!%p1869_p6), [#allocation4], %s286_s10 }
  0x35   : > { %s1887_s13 = scalar_lea.vmem (!%p1869_p6), [#allocation3], %s1316_s7 }
  0x38   : > { %1713 = dma.done.wait (%p1832_p7), %s287_s11, 4096  }
  0x39   : > { %1715 = vsyncadd (%p1832_p7), %s287_s11, 4294963200  ;;  %s296_s28 = scalar_lea.sflag [#allocation6], %s286_s10  ;;  %s1893_s16 = scalar_lea.vmem [#allocation5], %s1316_s7 }
  0x3a   : > { %1717 = dma.done.wait (%p1832_p7), %s296_s28, 4096  }
  0x3b   : > { %1719 = vsyncadd (%p1832_p7), %s296_s28, 4294963200  ;;  %v361_v0 = vld [vmem:[%s2036_s0] sm:$0xff]  ;;  %p1318_p9 = scmp.ne.s32.totalorder %s1734_s24, 0 }
  0x3c   : > { %v1902_v1 = vpack.c.bf16 %v361_v0, %v361_v0 }
  0x3d   : > { %366 = sbr.rel (%p1318_p9) target bundleno = 617 (0x269), region = 48 }
  0x42   : > { %v1540_v2 = vld [vmem:[%s2037_s1 + $0x38] sm:$0xff]   ;;  %494 = vst [vmem:[%s2040_s4] sm:$0xff] %v361_v0  ;;  %v1751_v3 = vmov 0.0   ;;  %v1541_v4 = vld [vmem:[%s2037_s1 + $0x30] sm:$0xff]   ;;  %vm1752_vm0 = vmmov 0   ;;  %v1542_v5 = vld [vmem:[%s2037_s1 + $0x28] sm:$0xff]   ;;  %v472_v11 = vlaneseq }
  0x43   : > { %1452 = vmatprep.subr.bf16.mxu0 %v1751_v3  ;;  %1468 = vmatprep.mubr.msk.bf16.mxu0 %vm1752_vm0, %v1751_v3  ;;  %v1543_v6 = vld [vmem:[%s2037_s1 + $0x20] sm:$0xff]   ;;  %v1544_v7 = vld [vmem:[%s2037_s1 + $0x18] sm:$0xff]   ;;  %v1545_v8 = vld [vmem:[%s2037_s1 + $0x10] sm:$0xff]  }
  0x44   : > { %1453 = vmatpush3.bf16.msra.mxu0 %v1540_v2  ;;  %v1546_v9 = vld [vmem:[%s2037_s1 + $0x8] sm:$0xff]   ;;  %v1547_v10 = vld [vmem:[%s2037_s1] sm:$0xff]   ;;  %v473_v12 = vand.u32 127, %v472_v11 }
  0x45   : > { %1454 = vmatprep.subr.bf16.mxu0 %v1751_v3 }
  0x46   : > { %vm474_vm1 = vcmp.lt.s32.totalorder %v473_v12, 8 }
  0x48   : > { %1455 = vmatpush3.bf16.msra.mxu0 %v1541_v4 }
  0x49   : > { %1456 = vmatprep.subr.bf16.mxu0 %v1751_v3 }
  0x4c   : > { %1457 = vmatpush3.bf16.msra.mxu0 %v1542_v5 }
  0x4d   : > { %1458 = vmatprep.subr.bf16.mxu0 %v1751_v3 }
  0x50   : > { %1459 = vmatpush3.bf16.msra.mxu0 %v1543_v6 }
  0x51   : > { %1460 = vmatprep.subr.bf16.mxu0 %v1751_v3 }
  0x54   : > { %1461 = vmatpush3.bf16.msra.mxu0 %v1544_v7 }
  0x55   : > { %1462 = vmatprep.subr.bf16.mxu0 %v1751_v3 }
  0x58   : > { %1463 = vmatpush3.bf16.msra.mxu0 %v1545_v8 }
  0x59   : > { %1464 = vmatprep.subr.bf16.mxu0 %v1751_v3 }
  0x5c   : > { %1465 = vmatpush3.bf16.msra.mxu0 %v1546_v9 }
  0x5d   : > { %1466 = vmatprep.subr.bf16.mxu0 %v1751_v3 }
  0x60   : > { %1467 = vmatpush3.bf16.msra.mxu0 %v1547_v10 }
  0x63   : > { %1469 = vmatmul.mubr.bf16.vlgmr.msra.gmra.mxu0 %v1902_v1 }
 0x123   : > { %v465_v13 = vpop.f32.mrf.mxu0 }
 0x124   : > { %471 = vst [vmem:[%s2041_s5] sm:$0xff] %v465_v13  ;;  %v475_v14 = vsel %vm474_vm1, %v465_v13, -1e+30 }
 0x125   : > { %476 = vmax.xlane.f32.xlu0 %v475_v14  ;;  %v1470_v15 = vpop.f32.mrf.mxu0 }
 0x127   : > { %v468_v16 = vpop.f32.mrf.mxu0 }
 0x129   : > { %v1471_v17 = vpop.f32.mrf.mxu0 }
 0x1ae   : > { %v477_v18 = vpop.xlane.xlu0 %476 }
 0x1af   : > { %v478_v19 = vsub.f32 %v475_v14, %v477_v18 }
 0x1b1   : > { %v479_v20 = vmul.f32 1.442695, %v478_v19 }
 0x1b3   : > { %1548 = vpow2.f32 %v479_v20 }
 0x1c0   : > { %v1549_v21 = vpop.eup %1548 }
 0x1c1   : > { %v481_v22 = vsel %vm474_vm1, %v1549_v21, 0.0 }
 0x1c2   : > { %482 = vadd.xlane.f32.xlu0 %v481_v22 }
 0x24b   : > { %v483_v23 = vpop.xlane.xlu0 %482 }
 0x24c   : > { %1550 = vrcp.f32 %v483_v23 }
 0x259   : > { %v1551_v24 = vpop.eup %1550 }
 0x25a   : > { %v485_v25 = vmul.f32 %v1551_v24, %v481_v22 }
 0x25c   : > { %486 = vst [vmem:[#allocation2] sm:$0xff] %v485_v25  ;;  %v487_v26 = vrot.slane %v485_v25, 4 }
 0x25e   : > { %v488_v27 = vadd.f32 %v487_v26, %v485_v25 }
 0x260   : > { %v489_v28 = vrot.slane %v488_v27, 2 }
 0x262   : > { %v490_v29 = vadd.f32 %v489_v28, %v488_v27 }
 0x264   : > { %v491_v30 = vrot.slane %v490_v29, 1 }
 0x266   : > { %v492_v31 = vadd.f32 %v491_v30, %v490_v29 }
 0x268   : > { %493 = vst [vmem:[%s2042_s6] sm:$0x1] %v492_v31 }
 0x269 PF: > { %v1552_v32 = vld [vmem:[%s1887_s13 + $0xe4] ss:$16 sps:$4 sm:$0xff]   ;;  %v1554_v33 = vld [vmem:[%s1887_s13 + $0xec] ss:$16 sps:$4 sm:$0xff]   ;;  %v1753_v34 = vmov 0   ;;  %s1359_s29 = sshll.u32 %s1734_s24, 2  ;;  %v774_v48 = vlaneseq }
 0x26a   : > { %719 = vmatprep.mubr.bf16.mxu0 %v1753_v34  ;;  %760 = vmatprep.mubr.bf16.mxu1 %v1753_v34  ;;  %v1556_v35 = vld [vmem:[%s1887_s13 + $0xe0] ss:$16 sps:$4 sm:$0xff]   ;;  %v1557_v36 = vld [vmem:[%s1887_s13 + $0xe8] ss:$16 sps:$4 sm:$0xff]   ;;  %v1558_v37 = vld [vmem:[%s1887_s13 + $0xc4] ss:$16 sps:$4 sm:$0xff]   ;;  %v777_v55 = vstv %s1359_s29 }
 0x26b   : > { %687 = vmatprep.subr.bf16.mxu0 %v1552_v32  ;;  %728 = vmatprep.subr.bf16.mxu1 %v1554_v33  ;;  %v1560_v38 = vld [vmem:[%s1887_s13 + $0xcc] ss:$16 sps:$4 sm:$0xff]   ;;  %v1562_v39 = vld [vmem:[%s1887_s13 + $0xc0] ss:$16 sps:$4 sm:$0xff]   ;;  %v1563_v40 = vld [vmem:[%s1887_s13 + $0xc8] ss:$16 sps:$4 sm:$0xff]  }
 0x26c   : > { %688 = vmatpush1.bf16.msra.mxu0 %v1556_v35  ;;  %729 = vmatpush1.bf16.msra.mxu1 %v1557_v36  ;;  %v1564_v41 = vld [vmem:[%s1887_s13 + $0xa4] ss:$16 sps:$4 sm:$0xff]   ;;  %v1566_v42 = vld [vmem:[%s1887_s13 + $0xac] ss:$16 sps:$4 sm:$0xff]   ;;  %v1568_v43 = vld [vmem:[%s1887_s13 + $0xa0] ss:$16 sps:$4 sm:$0xff]  }
 0x26d   : > { %689 = vmatprep.subr.bf16.mxu0 %v1558_v37  ;;  %730 = vmatprep.subr.bf16.mxu1 %v1560_v38  ;;  %v1569_v44 = vld [vmem:[%s1887_s13 + $0xa8] ss:$16 sps:$4 sm:$0xff]   ;;  %v1570_v45 = vld [vmem:[%s1887_s13 + $0x84] ss:$16 sps:$4 sm:$0xff]   ;;  %v1572_v46 = vld [vmem:[%s1887_s13 + $0x8c] ss:$16 sps:$4 sm:$0xff]  }
 0x26e   : > { %v1574_v47 = vld [vmem:[%s1887_s13 + $0x80] ss:$16 sps:$4 sm:$0xff]   ;;  %v1575_v49 = vld [vmem:[%s1887_s13 + $0x88] ss:$16 sps:$4 sm:$0xff]   ;;  %v1576_v50 = vld [vmem:[%s1887_s13 + $0x64] ss:$16 sps:$4 sm:$0xff]  }
 0x26f   : > { %v1578_v51 = vld [vmem:[%s1887_s13 + $0x6c] ss:$16 sps:$4 sm:$0xff]   ;;  %s783_s15 = sadd.s32 1, %s1359_s29  ;;  %s790_s17 = sadd.s32 2, %s1359_s29  ;;  %v1580_v52 = vld [vmem:[%s1887_s13 + $0x60] ss:$16 sps:$4 sm:$0xff]  }
 0x270   : > { %690 = vmatpush1.bf16.msra.mxu0 %v1562_v39  ;;  %731 = vmatpush1.bf16.msra.mxu1 %v1563_v40  ;;  %v1581_v53 = vld [vmem:[%s1887_s13 + $0x68] ss:$16 sps:$4 sm:$0xff]   ;;  %v775_v54 = vand.u32 127, %v774_v48  ;;  %s797_s24 = sadd.s32 3, %s1359_s29  ;;  %v1582_v56 = vld [vmem:[%s1887_s13 + $0x44] ss:$16 sps:$4 sm:$0xff]   ;;  %v784_v57 = vstv %s783_s15  ;;  %v791_v59 = vstv %s790_s17 }
 0x271   : > { %691 = vmatprep.subr.bf16.mxu0 %v1564_v41  ;;  %732 = vmatprep.subr.bf16.mxu1 %v1566_v42  ;;  %v1584_v58 = vld [vmem:[%s1887_s13 + $0x4c] ss:$16 sps:$4 sm:$0xff]   ;;  %v798_v60 = vstv %s797_s24  ;;  %v1586_v61 = vld [vmem:[%s1887_s13 + $0x40] ss:$16 sps:$4 sm:$0xff]   ;;  %v1587_v63 = vld [vmem:[%s1887_s13 + $0x48] ss:$16 sps:$4 sm:$0xff]  }
 0x272   : > { %vm1963_vm2 = vcmp.eq.s32.totalorder %v775_v54, %v777_v55  ;;  %vm785_vm3 = vcmp.eq.s32.totalorder %v775_v54, %v784_v57  ;;  %v1588_v0 = vld [vmem:[%s1887_s13 + $0x24] ss:$16 sps:$4 sm:$0xff]   ;;  %v1590_v2 = vld [vmem:[%s1887_s13 + $0x2c] ss:$16 sps:$4 sm:$0xff]   ;;  %vm792_vm4 = vcmp.eq.s32.totalorder %v775_v54, %v791_v59  ;;  %vm799_vm5 = vcmp.eq.s32.totalorder %v775_v54, %v798_v60  ;;  %v1592_v4 = vld [vmem:[%s1887_s13 + $0x20] ss:$16 sps:$4 sm:$0xff]  }
 0x273   : > { %v773_v3 = vld [vmem:[#allocation2] sm:$0xff]  ;;  %v1594_v8 = vld [vmem:[%s1887_s13 + $0x4] ss:$16 sps:$4 sm:$0xff]   ;;  %v1598_v12 = vld [vmem:[%s1887_s13] ss:$16 sps:$4 sm:$0xff]  }
 0x274   : > { %692 = vmatpush1.bf16.msra.mxu0 %v1568_v43  ;;  %733 = vmatpush1.bf16.msra.mxu1 %v1569_v44  ;;  %v1593_v5 = vld [vmem:[%s1887_s13 + $0x28] ss:$16 sps:$4 sm:$0xff]   ;;  %v779_v6 = vsel %vm1963_vm2, %v773_v3, 0.0  ;;  %v786_v7 = vsel %vm785_vm3, %v773_v3, 0.0  ;;  %v793_v9 = vsel %vm792_vm4, %v773_v3, 0.0  ;;  %v800_v10 = vsel %vm799_vm5, %v773_v3, 0.0 }
 0x275   : > { %693 = vmatprep.subr.bf16.mxu0 %v1570_v45  ;;  %734 = vmatprep.subr.bf16.mxu1 %v1572_v46  ;;  %v1596_v11 = vld [vmem:[%s1887_s13 + $0xc] ss:$16 sps:$4 sm:$0xff]   ;;  %v1599_v13 = vld [vmem:[%s1887_s13 + $0x8] ss:$16 sps:$4 sm:$0xff]   ;;  %v1604_v18 = vld [vmem:[%s1893_s16 + $0x70] sm:$0xff]  }
 0x276   : > { %780 = vadd.xlane.f32.xlu1 %v779_v6  ;;  %787 = vadd.xlane.f32.xlu0 %v786_v7  ;;  %v1600_v14 = vld [vmem:[%s1893_s16 + $0x78] sm:$0xff]   ;;  %v1605_v19 = vld [vmem:[%s1893_s16 + $0xf0] sm:$0xff]   ;;  %v1608_v22 = vld [vmem:[%s1893_s16 + $0x68] sm:$0xff]  }
 0x277   : > { %v1601_v15 = vld [vmem:[%s1893_s16 + $0xf8] sm:$0xff]   ;;  %v1606_v20 = vld [vmem:[%s1893_s16 + $0x30] sm:$0xff]   ;;  %v1609_v23 = vld [vmem:[%s1893_s16 + $0xe8] sm:$0xff]  }
 0x278   : > { %694 = vmatpush1.bf16.msra.mxu0 %v1574_v47  ;;  %735 = vmatpush1.bf16.msra.mxu1 %v1575_v49  ;;  %v1602_v16 = vld [vmem:[%s1893_s16 + $0x38] sm:$0xff]   ;;  %v1607_v21 = vld [vmem:[%s1893_s16 + $0xb0] sm:$0xff]   ;;  %v1610_v24 = vld [vmem:[%s1893_s16 + $0x28] sm:$0xff]  }
 0x279   : > { %695 = vmatprep.subr.bf16.mxu0 %v1576_v50  ;;  %736 = vmatprep.subr.bf16.mxu1 %v1578_v51  ;;  %v1603_v17 = vld [vmem:[%s1893_s16 + $0xb8] sm:$0xff]   ;;  %v1611_v25 = vld [vmem:[%s1893_s16 + $0xa8] sm:$0xff]   ;;  %v1613_v26 = vld [vmem:[%s1893_s16 + $0xe0] sm:$0xff]  }
 0x27a   : > { %794 = vadd.xlane.f32.xlu1 %v793_v9  ;;  %801 = vadd.xlane.f32.xlu0 %v800_v10  ;;  %v1614_v27 = vld [vmem:[%s1893_s16 + $0x20] sm:$0xff]   ;;  %v1616_v29 = vld [vmem:[%s1893_s16 + $0x58] sm:$0xff]   ;;  %v1620_v33 = vld [vmem:[%s1893_s16 + $0x50] sm:$0xff]  }
 0x27b   : > { %v1615_v28 = vld [vmem:[%s1893_s16 + $0xa0] sm:$0xff]   ;;  %v1617_v30 = vld [vmem:[%s1893_s16 + $0xd8] sm:$0xff]   ;;  %v1621_v34 = vld [vmem:[%s1893_s16 + $0xd0] sm:$0xff]  }
 0x27c   : > { %696 = vmatpush1.bf16.msra.mxu0 %v1580_v52  ;;  %737 = vmatpush1.bf16.msra.mxu1 %v1581_v53  ;;  %v1618_v31 = vld [vmem:[%s1893_s16 + $0x18] sm:$0xff]   ;;  %v1622_v35 = vld [vmem:[%s1893_s16 + $0x10] sm:$0xff]   ;;  %v1624_v37 = vld [vmem:[%s1893_s16 + $0x48] sm:$0xff]  }
 0x27d   : > { %697 = vmatprep.subr.bf16.mxu0 %v1582_v56  ;;  %738 = vmatprep.subr.bf16.mxu1 %v1584_v58  ;;  %v1619_v32 = vld [vmem:[%s1893_s16 + $0x98] sm:$0xff]   ;;  %v1623_v36 = vld [vmem:[%s1893_s16 + $0x90] sm:$0xff]   ;;  %v1625_v38 = vld [vmem:[%s1893_s16 + $0xc8] sm:$0xff]  }
 0x27e   : > { %v1626_v39 = vld [vmem:[%s1893_s16 + $0x8] sm:$0xff]   ;;  %v1628_v41 = vld [vmem:[%s1893_s16 + $0x40] sm:$0xff]  }
 0x27f   : > { %v1627_v40 = vld [vmem:[%s1893_s16 + $0x88] sm:$0xff]   ;;  %v1629_v42 = vld [vmem:[%s1893_s16 + $0xc0] sm:$0xff]  }
 0x280   : > { %698 = vmatpush1.bf16.msra.mxu0 %v1586_v61  ;;  %739 = vmatpush1.bf16.msra.mxu1 %v1587_v63  ;;  %v1630_v43 = vld [vmem:[%s1893_s16] sm:$0xff]  }
 0x281   : > { %699 = vmatprep.subr.bf16.mxu0 %v1588_v0  ;;  %740 = vmatprep.subr.bf16.mxu1 %v1590_v2  ;;  %v1631_v44 = vld [vmem:[%s1893_s16 + $0x80] sm:$0xff]  }
 0x284   : > { %700 = vmatpush1.bf16.msra.mxu0 %v1592_v4  ;;  %741 = vmatpush1.bf16.msra.mxu1 %v1593_v5 }
 0x285   : > { %701 = vmatprep.subr.bf16.mxu0 %v1594_v8  ;;  %742 = vmatprep.subr.bf16.mxu1 %v1596_v11 }
 0x288   : > { %702 = vmatpush1.bf16.msra.mxu0 %v1598_v12  ;;  %743 = vmatpush1.bf16.msra.mxu1 %v1599_v13  ;;  %v804_v12 = vld [vmem:[%s2040_s4] sm:$0xff] }
 0x289   : > { %1408 = vmatprep.subr.bf16.mxu0 %v1600_v14  ;;  %1430 = vmatprep.subr.bf16.mxu1 %v1601_v15 }
 0x28b   : > { %720 = vmatmul.mubr.bf16.vlgmr.msra.gmra.mxu0 %v1902_v1  ;;  %761 = vmatmul.mubr.bf16.vlgmr.msra.gmra.mxu1 %v1902_v1  ;;  %v1612_v1 = vld [vmem:[%s1893_s16 + $0x60] sm:$0xff]  }
 0x28c   : > { %1409 = vmatpush3.bf16.msra.mxu0 %v1602_v16  ;;  %1431 = vmatpush3.bf16.msra.mxu1 %v1603_v17 }
 0x28d   : > { %1410 = vmatprep.subr.bf16.mxu0 %v1604_v18  ;;  %1432 = vmatprep.subr.bf16.mxu1 %v1605_v19 }
 0x290   : > { %1411 = vmatpush3.bf16.msra.mxu0 %v1606_v20  ;;  %1433 = vmatpush3.bf16.msra.mxu1 %v1607_v21 }
 0x291   : > { %1412 = vmatprep.subr.bf16.mxu0 %v1608_v22  ;;  %1434 = vmatprep.subr.bf16.mxu1 %v1609_v23 }
 0x294   : > { %1413 = vmatpush3.bf16.msra.mxu0 %v1610_v24  ;;  %1435 = vmatpush3.bf16.msra.mxu1 %v1611_v25 }
 0x295   : > { %1414 = vmatprep.subr.bf16.mxu0 %v1612_v1  ;;  %1436 = vmatprep.subr.bf16.mxu1 %v1613_v26 }
 0x298   : > { %1415 = vmatpush3.bf16.msra.mxu0 %v1614_v27  ;;  %1437 = vmatpush3.bf16.msra.mxu1 %v1615_v28 }
 0x299   : > { %1416 = vmatprep.subr.bf16.mxu0 %v1616_v29  ;;  %1438 = vmatprep.subr.bf16.mxu1 %v1617_v30 }
 0x29c   : > { %1417 = vmatpush3.bf16.msra.mxu0 %v1618_v31  ;;  %1439 = vmatpush3.bf16.msra.mxu1 %v1619_v32 }
 0x29d   : > { %1418 = vmatprep.subr.bf16.mxu0 %v1620_v33  ;;  %1440 = vmatprep.subr.bf16.mxu1 %v1621_v34 }
 0x2a0   : > { %1419 = vmatpush3.bf16.msra.mxu0 %v1622_v35  ;;  %1441 = vmatpush3.bf16.msra.mxu1 %v1623_v36 }
 0x2a1   : > { %1420 = vmatprep.subr.bf16.mxu0 %v1624_v37  ;;  %1442 = vmatprep.subr.bf16.mxu1 %v1625_v38 }
 0x2a4   : > { %1421 = vmatpush3.bf16.msra.mxu0 %v1626_v39  ;;  %1443 = vmatpush3.bf16.msra.mxu1 %v1627_v40 }
 0x2a5   : > { %1422 = vmatprep.subr.bf16.mxu0 %v1628_v41  ;;  %1444 = vmatprep.subr.bf16.mxu1 %v1629_v42 }
 0x2a8   : > { %1423 = vmatpush3.bf16.msra.mxu0 %v1630_v43  ;;  %1445 = vmatpush3.bf16.msra.mxu1 %v1631_v44 }
 0x2ff   : > { %v781_v45 = vpop.xlane.xlu1 %780  ;;  %v788_v46 = vpop.xlane.xlu0 %787 }
 0x303   : > { %v795_v51 = vpop.xlane.xlu1 %794  ;;  %v802_v52 = vpop.xlane.xlu0 %801 }
 0x34b   : > { %v721_v47 = vpop.f32.mrf.mxu0  ;;  %v762_v48 = vpop.f32.mrf.mxu1 }
 0x34c   : > { %v769_v49 = vmax.f32 %v721_v47, 0.0  ;;  %v771_v50 = vmax.f32 %v762_v48, 0.0 }
 0x34d   : > { %v723_v53 = vpop.f32.mrf.mxu0  ;;  %v764_v54 = vpop.f32.mrf.mxu1 }
 0x34e   : > { %v770_v55 = vmax.f32 %v723_v53, 0.0  ;;  %v772_v56 = vmax.f32 %v764_v54, 0.0  ;;  %v782_v57 = vmul.f32 %v781_v45, %v769_v49  ;;  %v796_v58 = vmul.f32 %v795_v51, %v771_v50 }
 0x34f   : > { %v725_v59 = vpop.f32.mrf.mxu0  ;;  %v766_v60 = vpop.f32.mrf.mxu1 }
 0x350   : > { %v789_v61 = vmul.f32 %v788_v46, %v770_v55  ;;  %v803_v62 = vmul.f32 %v802_v52, %v772_v56  ;;  %v805_v4 = vpack.c.bf16 %v782_v57, %v782_v57  ;;  %v807_v5 = vpack.c.bf16 %v796_v58, %v796_v58 }
 0x351   : > { %v726_v63 = vpop.f32.mrf.mxu0  ;;  %v767_v0 = vpop.f32.mrf.mxu1 }
 0x352   : > { %v806_v2 = vpack.c.bf16 %v789_v61, %v789_v61  ;;  %v808_v3 = vpack.c.bf16 %v803_v62, %v803_v62 }
 0x354   : > { %1097 = vmatprep.mubr.bf16.mxu0 %v806_v2  ;;  %1137 = vmatprep.mubr.bf16.mxu1 %v808_v3 }
 0x355   : > { %1098 = vmatmul.mubr.bf16.vlgmr.msra.gmra.mxu0 %v805_v4  ;;  %1138 = vmatmul.mubr.bf16.vlgmr.msra.gmra.mxu1 %v807_v5 }
 0x415   : > { %v1424_v6 = vpop.f32.mrf.mxu0  ;;  %v1446_v7 = vpop.f32.mrf.mxu1 }
 0x417   : > { %v1425_v8 = vpop.f32.mrf.mxu0  ;;  %v1447_v9 = vpop.f32.mrf.mxu1 }
 0x418   : > { %v1426_v10 = vadd.f32 %v1425_v8, %v1424_v6  ;;  %v1448_v11 = vadd.f32 %v1447_v9, %v1446_v7 }
 0x419   : > { %v1427_v13 = vpop.f32.mrf.mxu0  ;;  %v1449_v14 = vpop.f32.mrf.mxu1 }
 0x41a   : > { %v1140_v15 = vadd.f32 %v1448_v11, %v1426_v10 }
 0x41b   : > { %v1428_v16 = vpop.f32.mrf.mxu0  ;;  %v1450_v17 = vpop.f32.mrf.mxu1 }
 0x41c   : > { %v1145_v18 = vadd.f32 %v1140_v15, %v804_v12 }
 0x41e   : > { %1146 = vst [vmem:[%s2040_s4] sm:$0xff] %v1145_v18 }
 0x41f PF: > { %s23_s26 = sadd.s32 1, %s1742_s26   ;;  %s2053_s12 = sld [smem:[#allocation9_spill]] }
 0x420   : > { %p20_p7 = scmp.ge.s32.totalorder %s23_s26, 4   ;;  %s2054_s21 = smov %s1726_s22 }
 0x421   : > { %s2055_s22 = smov %s1730_s23  ;;  %s2056_s23 = smov %s1838_s9 }
 0x422   : > { %s2057_s24 = smov %s1738_s25  ;;  %22 = sbr.rel (!%p20_p7) target bundleno = 8 (0x8), region = 120 }
 0x425   : > { %s2058_s25 = smov %s2053_s12 }
 0x427   :  { %1192 = vsyncpa [#allocation4], 1 }
 0x428   :  { %1194 = vsyncpa [#allocation4 + $0x1], 1 }
 0x429   :  { %1195 = vsyncpa [#allocation6], 1 }
 0x42a   :  { %1197 = vsyncpa [#allocation6 + $0x1], 1 }

</bundles_post_ra>
